<compile_context>
chip_gen: v7x
topology: tpu7x:2x2x1
jax: 0.10.0
libtpu: 0.0.40
codegen_flags: <defaults>
</compile_context>

<pallas_src>
import functools

import jax
import jax.numpy as jnp
import numpy as np
from jax.experimental import pallas as pl
from jax.experimental.pallas import tpu as pltpu

LN_EPS = 1e-5


def _layer_norm(t, gamma, beta):
    m = jnp.mean(t, axis=-1, keepdims=True)
    v = jnp.mean((t - m) ** 2, axis=-1, keepdims=True)
    return (t - m) * jax.lax.rsqrt(v + LN_EPS) * gamma + beta


def lga_kernel(x_ref, z_ref, gx_ref, bx_ref, gz_ref, bz_ref,
               wz1_ref, wz2_ref, wq_ref, wk_ref, wv_ref, wo_ref, bo_ref, o_ref,
               *, batch_block, n_tokens, heads, dim_head, compute_dtype):
    TB, N, Dh = batch_block, n_tokens, dim_head
    rows = TB * N
    Dx = gx_ref.shape[-1]
    cdt = compute_dtype

    x = x_ref[...].astype(jnp.float32)                        # (rows, Dx) tokens
    z = z_ref[...].astype(jnp.float32)                        # (TB, Dz) latents

    # --- latent branch: LayerNorm(z) -> two Linears (pre-split to_z) -> SiLU ---
    z_ln = _layer_norm(z, gz_ref[...], bz_ref[...]).astype(cdt)
    z1 = jnp.dot(z_ln, wz1_ref[...], preferred_element_type=jnp.float32)   # (TB, Dx)
    z2 = jnp.dot(z_ln, wz2_ref[...], preferred_element_type=jnp.float32)   # (TB, Dx)
    z1 = z1 * jax.nn.sigmoid(z1)          # SiLU (elementwise, so split-then-SiLU ok)
    z2 = z2 * jax.nn.sigmoid(z2)

    # --- token branch: LayerNorm(x) + latent modulation as a single broadcast ---
    x_ln = _layer_norm(x, gx_ref[...], bx_ref[...])                        # (rows, Dx)
    xz = x_ln.reshape(TB, N, Dx) * z1[:, None, :] + z2[:, None, :]
    xz = xz.reshape(rows, Dx).astype(cdt)

    # --- Q/K/V: three full-width dots, lane-aligned (scale folded into wq) ---
    q = jnp.dot(xz, wq_ref[...], preferred_element_type=jnp.float32)       # (rows, inner)
    k = jnp.dot(xz, wk_ref[...], preferred_element_type=jnp.float32)
    v = jnp.dot(xz, wv_ref[...], preferred_element_type=jnp.float32)

    # --- attention: short static unroll over heads, each head batched over TB ---
    # (Mosaic dot_general reliably supports a single leading batch dim; folding
    #  heads into the einsum batch would require an in-kernel sublane transpose.)
    head_outs = []
    for h in range(heads):
        lo = h * Dh
        qh = q[:, lo:lo + Dh].reshape(TB, N, Dh).astype(cdt)
        kh = k[:, lo:lo + Dh].reshape(TB, N, Dh).astype(cdt)
        vh = v[:, lo:lo + Dh].reshape(TB, N, Dh).astype(cdt)
        sim = jnp.einsum("bqd,bkd->bqk", qh, kh,
                         preferred_element_type=jnp.float32)               # (TB, N, N)
        sim = sim - jnp.max(sim, axis=-1, keepdims=True)
        p = jnp.exp(sim)
        attn = p * pl.reciprocal(jnp.sum(p, axis=-1, keepdims=True), approx=True)
        oh = jnp.einsum("bqk,bkd->bqd", attn.astype(cdt), vh,
                        preferred_element_type=jnp.float32)                # (TB, N, Dh)
        head_outs.append(oh.reshape(rows, Dh))
    heads_cat = head_outs[0] if heads == 1 else jnp.concatenate(head_outs, axis=-1)

    # --- single output projection with K = inner; Dropout(0.0) is identity ---
    out = jnp.dot(heads_cat.astype(cdt), wo_ref[...],
                  preferred_element_type=jnp.float32) + bo_ref[...]        # (rows, Dx)

    # Store; when the out block is the lane-dense (rows*Dx//128, 128) view the
    # reshape folds sublanes into full 128-lane rows, otherwise it is a no-op.
    o_ref[...] = out.reshape(o_ref.shape).astype(o_ref.dtype)


def _vmem_capacity_bytes():
    try:
        info = pltpu.get_tpu_info()
        cap = getattr(info, "vmem_capacity_bytes", None)
        if cap:
            return int(cap)
    except Exception:
        pass
    return 64 * 1024 * 1024          # conservative default (v7x per-core VMEM)


def _estimate_block_vmem_bytes(tb, n_tokens, x_dim, z_dim, inner, io_bytes, cdt_bytes):
    rows = tb * n_tokens
    io = rows * x_dim * io_bytes * 2 * 2                      # x + out blocks, double-buffered
    wts = (2 * z_dim * x_dim + 4 * x_dim * inner) * cdt_bytes  # to_z split, wq/wk/wv, wo
    wts += (2 * x_dim + 2 * z_dim + x_dim) * 4                 # LN affines + out bias (f32)
    live = rows * x_dim * 4 * 4                                # x, x_ln, xz, out (f32 working set)
    live += rows * inner * 4 * 4                               # q, k, v + concatenated head outs
    live += tb * n_tokens * n_tokens * 4 * 2                   # sim + softmax numerator (one head)
    return io + wts + live


def _pick_batch_block(batch, n_tokens, x_dim, z_dim, inner, io_bytes, cdt_bytes, vmem_budget):
    divisors = [d for d in range(1, batch + 1) if batch % d == 0]
    # >=2 grid blocks whenever possible: feeds both v7x TensorCores and lets the
    # x/out DMA pipeline overlap compute on single-core chips.
    cands = [d for d in divisors if d <= max(1, batch // 2)] or [1]
    # (8,128) rule on the (rows, Dx) token slab: rows % 8 == 0 unless full-array block.
    cands = [d for d in cands if (d * n_tokens) % 8 == 0] or [batch]
    fits = [d for d in cands if _estimate_block_vmem_bytes(
        d, n_tokens, x_dim, z_dim, inner, io_bytes, cdt_bytes) <= vmem_budget]
    if not fits:
        fits = [min(cands)]
    # Prefer MXU-aligned row counts (256 on v6e/v7x, 128 on v5e), else largest fit.
    for align in (256, 128):
        aligned = [d for d in fits if (d * n_tokens) % align == 0]
        if aligned:
            return max(aligned)
    return max(fits)


def latent_guided_attention(x, z, params, *, heads, dim_head,
                            compute_dtype=jnp.bfloat16, batch_block=None):
    B, N, Dx = x.shape
    Dz = z.shape[-1]
    inner = heads * dim_head
    scale = dim_head ** (-0.5)
    cdt = compute_dtype

    io_bytes = jnp.dtype(x.dtype).itemsize
    cdt_bytes = jnp.dtype(cdt).itemsize

    # Generation-aware VMEM budget: ~48 MiB on v7x (64 MiB/TC), ~96 MiB on v5e/v6e.
    vmem_cap = _vmem_capacity_bytes()
    vmem_budget = max(32 * 1024 * 1024, int(0.75 * vmem_cap))

    tb = batch_block if batch_block is not None else _pick_batch_block(
        B, N, Dx, Dz, inner, io_bytes, cdt_bytes, vmem_budget)
    if B % tb != 0:
        tb = B
    rows = tb * N
    if rows % 8 != 0 and rows != B * N:       # keep the (8,128) block rule satisfied
        tb, rows = B, B * N
    num_blocks = B // tb

    # One-off wrapper-side weight re-packing (all free outside the kernel):
    #  * softmax scale folded into the q columns,
    #  * to_z split in two so the kernel never slices the latent projection,
    #  * matmul weights cast to compute_dtype (bf16 default, f32 accumulation in-kernel).
    wq = (params["wq"] * scale).astype(cdt)
    wk = params["wk"].astype(cdt)
    wv = params["wv"].astype(cdt)
    wz1 = params["wz"][:, :Dx].astype(cdt)
    wz2 = params["wz"][:, Dx:].astype(cdt)
    wo = params["wo"].astype(cdt)

    x_flat = x.reshape(B * N, Dx)             # free reshape outside the kernel

    # Lane-dense output view is legal only if every out block's flattened row count
    # is a multiple of 8 sublanes (or the block covers the whole array).
    flat_block_rows = (rows * Dx) // 128
    lane_dense_ok = (
        Dx % 128 != 0
        and (rows * Dx) % 128 == 0
        and (flat_block_rows % 8 == 0 or num_blocks == 1)
    )

    kernel = functools.partial(
        lga_kernel, batch_block=tb, n_tokens=N, heads=heads,
        dim_head=dim_head, compute_dtype=cdt)

    def build_and_run(lane_dense, single_buffer_weights):
        def const_spec(shape):
            zeros = (0,) * len(shape)
            idx = lambda b, _z=zeros: _z
            if single_buffer_weights and hasattr(pl, "Buffered"):
                try:
                    # Constant blocks never change -> single buffer saves VMEM.
                    return pl.BlockSpec(shape, idx,
                                        pipeline_mode=pl.Buffered(buffer_count=1))
                except Exception:
                    pass
            return pl.BlockSpec(shape, idx)

        if lane_dense:
            out_shape = jax.ShapeDtypeStruct(((B * N * Dx) // 128, 128), x.dtype)
            out_spec = pl.BlockSpec((flat_block_rows, 128), lambda b: (b, 0))
        else:
            out_shape = jax.ShapeDtypeStruct((B * N, Dx), x.dtype)
            out_spec = pl.BlockSpec((rows, Dx), lambda b: (b, 0))

        call = pl.pallas_call(
            kernel,
            out_shape=out_shape,
            grid_spec=pltpu.PrefetchScalarGridSpec(
                num_scalar_prefetch=0,
                grid=(num_blocks,),
                in_specs=[
                    pl.BlockSpec((rows, Dx), lambda b: (b, 0)),           # x tokens (TB*N rows)
                    pl.BlockSpec((tb, None, Dz), lambda b: (b, 0, 0)),    # z latents (dim-1 squeezed)
                    const_spec((1, Dx)), const_spec((1, Dx)),             # ln_x gamma / beta
                    const_spec((1, Dz)), const_spec((1, Dz)),             # ln_z gamma / beta
                    const_spec((Dz, Dx)), const_spec((Dz, Dx)),           # to_z weight (split)
                    const_spec((Dx, inner)),                              # wq (scale folded)
                    const_spec((Dx, inner)),                              # wk
                    const_spec((Dx, inner)),                              # wv
                    const_spec((inner, Dx)),                              # to_out weight
                    const_spec((1, Dx)),                                  # to_out bias
                ],
                out_specs=out_spec,
            ),
            compiler_params=pltpu.CompilerParams(
                dimension_semantics=("parallel",),
                vmem_limit_bytes=int(vmem_budget)),
        )
        out = call(x_flat, z, params["gx"], params["bx"], params["gz"], params["bz"],
                   wz1, wz2, wq, wk, wv, wo, params["bo"])
        return out.reshape(B, N, Dx)

    # Most-optimized config first; degrade gracefully if this jax/Mosaic version
    # rejects an optional feature (single-buffered specs / in-kernel lane fold).
    attempts = []
    for ld in ([True, False] if lane_dense_ok else [False]):
        for sb in (True, False):
            attempts.append((ld, sb))
    last_err = None
    for ld, sb in attempts:
        try:
            return build_and_run(ld, sb)
        except Exception as e:          # pragma: no cover - depends on jax version
            last_err = e
    raise last_err


def reference(x, z, p, *, heads, dim_head):
    Dx = x.shape[-1]
    zt = _layer_norm(z, p["gz"], p["bz"]) @ p["wz"]
    zt = zt * jax.nn.sigmoid(zt)
    z1, z2 = zt[..., :Dx], zt[..., Dx:]
    xz = _layer_norm(x, p["gx"], p["bx"]) * z1 + z2
    q = xz @ p["wq"]
    k = xz @ p["wk"]
    v = xz @ p["wv"]
    B, N, inner = q.shape
    split = lambda t: t.reshape(B, N, heads, dim_head).transpose(0, 2, 1, 3)
    qh, kh, vh = split(q), split(k), split(v)
    sim = jnp.einsum("bhid,bhjd->bhij", qh, kh) * dim_head ** (-0.5)
    attn = jax.nn.softmax(sim, axis=-1)
    out = jnp.einsum("bhij,bhjd->bhid", attn, vh)
    out = out.transpose(0, 2, 1, 3).reshape(B, N, inner)
    return out @ p["wo"] + p["bo"]


if __name__ == "__main__":
    def make_params(key, x_dim, z_dim, inner):
        ks = jax.random.split(key, 10)
        return {
            "gx": 1.0 + 0.05 * jax.random.normal(ks[0], (1, x_dim), jnp.float32),
            "bx": 0.05 * jax.random.normal(ks[1], (1, x_dim), jnp.float32),
            "gz": 1.0 + 0.05 * jax.random.normal(ks[2], (1, z_dim), jnp.float32),
            "bz": 0.05 * jax.random.normal(ks[3], (1, z_dim), jnp.float32),
            "wz": 0.1 * jax.random.normal(ks[4], (z_dim, 2 * x_dim), jnp.float32),
            "wq": 0.1 * jax.random.normal(ks[5], (x_dim, inner), jnp.float32),
            "wk": 0.1 * jax.random.normal(ks[6], (x_dim, inner), jnp.float32),
            "wv": 0.1 * jax.random.normal(ks[7], (x_dim, inner), jnp.float32),
            "wo": 0.1 * jax.random.normal(ks[8], (inner, x_dim), jnp.float32),
            "bo": 0.05 * jax.random.normal(ks[9], (1, x_dim), jnp.float32),
        }

    root = jax.random.PRNGKey(0)

    # --- case 1: small module-consistent shapes ---
    B, N, x_dim, z_dim, heads, dim_head = 2, 8, 32, 16, 2, 16
    k_case, k_x, k_z = jax.random.split(jax.random.fold_in(root, 1), 3)
    x = jax.random.normal(k_x, (B, N, x_dim), jnp.float32)
    z = jax.random.normal(k_z, (B, 1, z_dim), jnp.float32)
    params = make_params(k_case, x_dim, z_dim, heads * dim_head)
    ref = reference(x, z, params, heads=heads, dim_head=dim_head)

    out_f32 = latent_guided_attention(x, z, params, heads=heads, dim_head=dim_head,
                                      compute_dtype=jnp.float32)
    out_f32 = jax.block_until_ready(out_f32)
    np.testing.assert_allclose(np.asarray(out_f32), np.asarray(ref), rtol=5e-3, atol=5e-3)

    out_bf16 = latent_guided_attention(x, z, params, heads=heads, dim_head=dim_head,
                                       compute_dtype=jnp.bfloat16)
    out_bf16 = jax.block_until_ready(out_bf16)
    np.testing.assert_allclose(np.asarray(out_bf16), np.asarray(ref), rtol=2e-2, atol=2e-2)

    # --- case 2: larger shape exercising multi-block grid, MXU-aligned rows and
    #     the lane-dense output store path ---
    B, N, x_dim, z_dim, heads, dim_head = 8, 32, 64, 32, 4, 32
    k_case, k_x, k_z = jax.random.split(jax.random.fold_in(root, 2), 3)
    x = jax.random.normal(k_x, (B, N, x_dim), jnp.float32)
    z = jax.random.normal(k_z, (B, 1, z_dim), jnp.float32)
    params = make_params(k_case, x_dim, z_dim, heads * dim_head)
    ref = reference(x, z, params, heads=heads, dim_head=dim_head)

    out2 = latent_guided_attention(x, z, params, heads=heads, dim_head=dim_head,
                                   compute_dtype=jnp.bfloat16)
    out2 = jax.block_until_ready(out2)
    np.testing.assert_allclose(np.asarray(out2), np.asarray(ref), rtol=3e-2, atol=3e-2)

    print("KERNEL_OK")
</pallas_src>

<mosaic_0001>
module attributes {stable_mosaic.version = 11 : i64} {
  func.func @lga_kernel(%arg0: i32, %arg1: memref<8x32xf32, #tpu.memory_space<vmem>>, %arg2: memref<1x1x16xf32, #tpu.memory_space<vmem>>, %arg3: memref<1x32xf32, #tpu.memory_space<vmem>>, %arg4: memref<1x32xf32, #tpu.memory_space<vmem>>, %arg5: memref<1x16xf32, #tpu.memory_space<vmem>>, %arg6: memref<1x16xf32, #tpu.memory_space<vmem>>, %arg7: memref<16x32xf32, #tpu.memory_space<vmem>>, %arg8: memref<16x32xf32, #tpu.memory_space<vmem>>, %arg9: memref<32x32xf32, #tpu.memory_space<vmem>>, %arg10: memref<32x32xf32, #tpu.memory_space<vmem>>, %arg11: memref<32x32xf32, #tpu.memory_space<vmem>>, %arg12: memref<32x32xf32, #tpu.memory_space<vmem>>, %arg13: memref<1x32xf32, #tpu.memory_space<vmem>>, %arg14: memref<8x32xf32, #tpu.memory_space<vmem>>) attributes {dimension_semantics = [#tpu.dimension_semantics<parallel>], iteration_bounds = array<i64: 2>, scalar_prefetch = 0 : i64, scratch_operands = 0 : i64, tpu.core_type = #tpu.core_type<tc>, window_params = [{transform_indices = @transform_0, window_bounds = array<i64: 8, 32>}, {transform_indices = @transform_1, window_bounds = array<i64: 1, 1, 16>}, {pipeline_mode = #tpu.pipeline_mode<synchronous>, transform_indices = @transform_2, window_bounds = array<i64: 1, 32>}, {pipeline_mode = #tpu.pipeline_mode<synchronous>, transform_indices = @transform_3, window_bounds = array<i64: 1, 32>}, {pipeline_mode = #tpu.pipeline_mode<synchronous>, transform_indices = @transform_4, window_bounds = array<i64: 1, 16>}, {pipeline_mode = #tpu.pipeline_mode<synchronous>, transform_indices = @transform_5, window_bounds = array<i64: 1, 16>}, {pipeline_mode = #tpu.pipeline_mode<synchronous>, transform_indices = @transform_6, window_bounds = array<i64: 16, 32>}, {pipeline_mode = #tpu.pipeline_mode<synchronous>, transform_indices = @transform_7, window_bounds = array<i64: 16, 32>}, {pipeline_mode = #tpu.pipeline_mode<synchronous>, transform_indices = @transform_8, window_bounds = array<i64: 32, 32>}, {pipeline_mode = #tpu.pipeline_mode<synchronous>, transform_indices = @transform_9, window_bounds = array<i64: 32, 32>}, {pipeline_mode = #tpu.pipeline_mode<synchronous>, transform_indices = @transform_10, window_bounds = array<i64: 32, 32>}, {pipeline_mode = #tpu.pipeline_mode<synchronous>, transform_indices = @transform_11, window_bounds = array<i64: 32, 32>}, {pipeline_mode = #tpu.pipeline_mode<synchronous>, transform_indices = @transform_12, window_bounds = array<i64: 1, 32>}, {transform_indices = @transform_13, window_bounds = array<i64: 8, 32>}]} {
    %c0 = arith.constant 0 : index
    %c0_0 = arith.constant 0 : index
    %0 = vector.load %arg1[%c0, %c0_0] : memref<8x32xf32, #tpu.memory_space<vmem>>, vector<8x32xf32>
    %c0_1 = arith.constant 0 : index
    %c0_2 = arith.constant 0 : index
    %c0_3 = arith.constant 0 : index
    %1 = vector.load %arg2[%c0_1, %c0_2, %c0_3] : memref<1x1x16xf32, #tpu.memory_space<vmem>>, vector<1x1x16xf32>
    %2 = vector.shape_cast %1 : vector<1x1x16xf32> to vector<1x16xf32>
    %c0_4 = arith.constant 0 : index
    %c0_5 = arith.constant 0 : index
    %3 = vector.load %arg5[%c0_4, %c0_5] : memref<1x16xf32, #tpu.memory_space<vmem>>, vector<1x16xf32>
    %c0_6 = arith.constant 0 : index
    %c0_7 = arith.constant 0 : index
    %4 = vector.load %arg6[%c0_6, %c0_7] : memref<1x16xf32, #tpu.memory_space<vmem>>, vector<1x16xf32>
    %cst = arith.constant dense<0.000000e+00> : vector<1xf32>
    %5 = vector.multi_reduction <add>, %2, %cst [1] : vector<1x16xf32> to vector<1xf32>
    %6 = vector.shape_cast %5 : vector<1xf32> to vector<1x1xf32>
    %cst_8 = arith.constant 1.600000e+01 : f32
    %7 = vector.broadcast %cst_8 : f32 to vector<1x1xf32>
    %8 = arith.divf %6, %7 : vector<1x1xf32>
    %9 = vector.broadcast %8 : vector<1x1xf32> to vector<1x16xf32>
    %10 = arith.subf %2, %9 : vector<1x16xf32>
    %11 = arith.mulf %10, %10 : vector<1x16xf32>
    %cst_9 = arith.constant dense<0.000000e+00> : vector<1xf32>
    %12 = vector.multi_reduction <add>, %11, %cst_9 [1] : vector<1x16xf32> to vector<1xf32>
    %13 = vector.shape_cast %12 : vector<1xf32> to vector<1x1xf32>
    %cst_10 = arith.constant 1.600000e+01 : f32
    %14 = vector.broadcast %cst_10 : f32 to vector<1x1xf32>
    %15 = arith.divf %13, %14 : vector<1x1xf32>
    %16 = vector.broadcast %8 : vector<1x1xf32> to vector<1x16xf32>
    %17 = arith.subf %2, %16 : vector<1x16xf32>
    %cst_11 = arith.constant 9.99999974E-6 : f32
    %18 = vector.broadcast %cst_11 : f32 to vector<1x1xf32>
    %19 = arith.addf %15, %18 : vector<1x1xf32>
    %20 = math.rsqrt %19 : vector<1x1xf32>
    %21 = vector.broadcast %20 : vector<1x1xf32> to vector<1x16xf32>
    %22 = arith.mulf %17, %21 : vector<1x16xf32>
    %23 = arith.mulf %22, %3 : vector<1x16xf32>
    %24 = arith.addf %23, %4 : vector<1x16xf32>
    %c0_12 = arith.constant 0 : index
    %c0_13 = arith.constant 0 : index
    %25 = vector.load %arg7[%c0_12, %c0_13] : memref<16x32xf32, #tpu.memory_space<vmem>>, vector<16x32xf32>
    %cst_14 = arith.constant dense<0.000000e+00> : vector<1x32xf32>
    %26 = tpu.matmul %24, %25, %cst_14 {dimension_numbers = #tpu.dot_dimension_numbers<[1], [0], [0], [1], [0, 0, 1, 1], [], []>} : vector<1x16xf32>, vector<16x32xf32>, vector<1x32xf32> -> vector<1x32xf32>
    %c0_15 = arith.constant 0 : index
    %c0_16 = arith.constant 0 : index
    %27 = vector.load %arg8[%c0_15, %c0_16] : memref<16x32xf32, #tpu.memory_space<vmem>>, vector<16x32xf32>
    %cst_17 = arith.constant dense<0.000000e+00> : vector<1x32xf32>
    %28 = tpu.matmul %24, %27, %cst_17 {dimension_numbers = #tpu.dot_dimension_numbers<[1], [0], [0], [1], [0, 0, 1, 1], [], []>} : vector<1x16xf32>, vector<16x32xf32>, vector<1x32xf32> -> vector<1x32xf32>
    %29 = arith.negf %26 : vector<1x32xf32>
    %30 = math.exp %29 : vector<1x32xf32>
    %cst_18 = arith.constant 1.000000e+00 : f32
    %31 = vector.broadcast %cst_18 : f32 to vector<1x32xf32>
    %32 = arith.addf %31, %30 : vector<1x32xf32>
    %33 = arith.divf %31, %32 : vector<1x32xf32>
    %34 = arith.mulf %26, %33 : vector<1x32xf32>
    %35 = arith.negf %28 : vector<1x32xf32>
    %36 = math.exp %35 : vector<1x32xf32>
    %cst_19 = arith.constant 1.000000e+00 : f32
    %37 = vector.broadcast %cst_19 : f32 to vector<1x32xf32>
    %38 = arith.addf %37, %36 : vector<1x32xf32>
    %39 = arith.divf %37, %38 : vector<1x32xf32>
    %40 = arith.mulf %28, %39 : vector<1x32xf32>
    %c0_20 = arith.constant 0 : index
    %c0_21 = arith.constant 0 : index
    %41 = vector.load %arg3[%c0_20, %c0_21] : memref<1x32xf32, #tpu.memory_space<vmem>>, vector<1x32xf32>
    %c0_22 = arith.constant 0 : index
    %c0_23 = arith.constant 0 : index
    %42 = vector.load %arg4[%c0_22, %c0_23] : memref<1x32xf32, #tpu.memory_space<vmem>>, vector<1x32xf32>
    %cst_24 = arith.constant dense<0.000000e+00> : vector<8xf32>
    %43 = vector.multi_reduction <add>, %0, %cst_24 [1] : vector<8x32xf32> to vector<8xf32>
    %44 = vector.shape_cast %43 : vector<8xf32> to vector<8x1xf32>
    %cst_25 = arith.constant 3.200000e+01 : f32
    %45 = vector.broadcast %cst_25 : f32 to vector<8x1xf32>
    %46 = arith.divf %44, %45 : vector<8x1xf32>
    %47 = vector.broadcast %46 : vector<8x1xf32> to vector<8x32xf32>
    %48 = arith.subf %0, %47 : vector<8x32xf32>
    %49 = arith.mulf %48, %48 : vector<8x32xf32>
    %cst_26 = arith.constant dense<0.000000e+00> : vector<8xf32>
    %50 = vector.multi_reduction <add>, %49, %cst_26 [1] : vector<8x32xf32> to vector<8xf32>
    %51 = vector.shape_cast %50 : vector<8xf32> to vector<8x1xf32>
    %cst_27 = arith.constant 3.200000e+01 : f32
    %52 = vector.broadcast %cst_27 : f32 to vector<8x1xf32>
    %53 = arith.divf %51, %52 : vector<8x1xf32>
    %54 = vector.broadcast %46 : vector<8x1xf32> to vector<8x32xf32>
    %55 = arith.subf %0, %54 : vector<8x32xf32>
    %cst_28 = arith.constant 9.99999974E-6 : f32
    %56 = vector.broadcast %cst_28 : f32 to vector<8x1xf32>
    %57 = arith.addf %53, %56 : vector<8x1xf32>
    %58 = math.rsqrt %57 : vector<8x1xf32>
    %59 = vector.broadcast %58 : vector<8x1xf32> to vector<8x32xf32>
    %60 = arith.mulf %55, %59 : vector<8x32xf32>
    %61 = vector.broadcast %41 : vector<1x32xf32> to vector<8x32xf32>
    %62 = arith.mulf %60, %61 : vector<8x32xf32>
    %63 = vector.broadcast %42 : vector<1x32xf32> to vector<8x32xf32>
    %64 = arith.addf %62, %63 : vector<8x32xf32>
    %65 = vector.shape_cast %64 : vector<8x32xf32> to vector<1x8x32xf32>
    %66 = vector.shape_cast %34 : vector<1x32xf32> to vector<1x1x32xf32>
    %67 = vector.broadcast %66 : vector<1x1x32xf32> to vector<1x8x32xf32>
    %68 = arith.mulf %65, %67 : vector<1x8x32xf32>
    %69 = vector.shape_cast %40 : vector<1x32xf32> to vector<1x1x32xf32>
    %70 = vector.broadcast %69 : vector<1x1x32xf32> to vector<1x8x32xf32>
    %71 = arith.addf %68, %70 : vector<1x8x32xf32>
    %72 = vector.shape_cast %71 : vector<1x8x32xf32> to vector<8x32xf32>
    %c0_29 = arith.constant 0 : index
    %c0_30 = arith.constant 0 : index
    %73 = vector.load %arg9[%c0_29, %c0_30] : memref<32x32xf32, #tpu.memory_space<vmem>>, vector<32x32xf32>
    %cst_31 = arith.constant dense<0.000000e+00> : vector<8x32xf32>
    %74 = tpu.matmul %72, %73, %cst_31 {dimension_numbers = #tpu.dot_dimension_numbers<[1], [0], [0], [1], [0, 0, 1, 1], [], []>} : vector<8x32xf32>, vector<32x32xf32>, vector<8x32xf32> -> vector<8x32xf32>
    %c0_32 = arith.constant 0 : index
    %c0_33 = arith.constant 0 : index
    %75 = vector.load %arg10[%c0_32, %c0_33] : memref<32x32xf32, #tpu.memory_space<vmem>>, vector<32x32xf32>
    %cst_34 = arith.constant dense<0.000000e+00> : vector<8x32xf32>
    %76 = tpu.matmul %72, %75, %cst_34 {dimension_numbers = #tpu.dot_dimension_numbers<[1], [0], [0], [1], [0, 0, 1, 1], [], []>} : vector<8x32xf32>, vector<32x32xf32>, vector<8x32xf32> -> vector<8x32xf32>
    %c0_35 = arith.constant 0 : index
    %c0_36 = arith.constant 0 : index
    %77 = vector.load %arg11[%c0_35, %c0_36] : memref<32x32xf32, #tpu.memory_space<vmem>>, vector<32x32xf32>
    %cst_37 = arith.constant dense<0.000000e+00> : vector<8x32xf32>
    %78 = tpu.matmul %72, %77, %cst_37 {dimension_numbers = #tpu.dot_dimension_numbers<[1], [0], [0], [1], [0, 0, 1, 1], [], []>} : vector<8x32xf32>, vector<32x32xf32>, vector<8x32xf32> -> vector<8x32xf32>
    %79 = vector.extract_strided_slice %74 {offsets = [0, 0], sizes = [8, 16], strides = [1, 1]} : vector<8x32xf32> to vector<8x16xf32>
    %80 = vector.shape_cast %79 : vector<8x16xf32> to vector<1x8x16xf32>
    %81 = vector.extract_strided_slice %76 {offsets = [0, 0], sizes = [8, 16], strides = [1, 1]} : vector<8x32xf32> to vector<8x16xf32>
    %82 = vector.shape_cast %81 : vector<8x16xf32> to vector<1x8x16xf32>
    %83 = vector.extract_strided_slice %78 {offsets = [0, 0], sizes = [8, 16], strides = [1, 1]} : vector<8x32xf32> to vector<8x16xf32>
    %84 = vector.shape_cast %83 : vector<8x16xf32> to vector<1x8x16xf32>
    "tpu.trace_start"() <{level = 10 : i32, message = "bqd,bkd->bqk"}> : () -> ()
    %cst_38 = arith.constant dense<0.000000e+00> : vector<1x8x8xf32>
    %85 = tpu.matmul %80, %82, %cst_38 {dimension_numbers = #tpu.dot_dimension_numbers<[2], [2], [1], [1], [0, 0, 0, 1, 1, 1], [0], [0]>} : vector<1x8x16xf32>, vector<1x8x16xf32>, vector<1x8x8xf32> -> vector<1x8x8xf32>
    "tpu.trace_stop"() : () -> ()
    %cst_39 = arith.constant dense<0xFF800000> : vector<1x8xf32>
    %86 = vector.multi_reduction <maximumf>, %85, %cst_39 [2] : vector<1x8x8xf32> to vector<1x8xf32>
    %87 = vector.shape_cast %86 : vector<1x8xf32> to vector<1x8x1xf32>
    %88 = vector.broadcast %87 : vector<1x8x1xf32> to vector<1x8x8xf32>
    %89 = arith.subf %85, %88 : vector<1x8x8xf32>
    %90 = math.exp %89 : vector<1x8x8xf32>
    %cst_40 = arith.constant dense<0.000000e+00> : vector<1x8xf32>
    %91 = vector.multi_reduction <add>, %90, %cst_40 [2] : vector<1x8x8xf32> to vector<1x8xf32>
    %92 = vector.shape_cast %91 : vector<1x8xf32> to vector<1x8x1xf32>
    %93 = tpu.reciprocal %92 {approx = true} : vector<1x8x1xf32> -> vector<1x8x1xf32>
    %94 = vector.broadcast %93 : vector<1x8x1xf32> to vector<1x8x8xf32>
    %95 = arith.mulf %90, %94 : vector<1x8x8xf32>
    "tpu.trace_start"() <{level = 10 : i32, message = "bqk,bkd->bqd"}> : () -> ()
    %cst_41 = arith.constant dense<0.000000e+00> : vector<1x8x16xf32>
    %96 = tpu.matmul %95, %84, %cst_41 {dimension_numbers = #tpu.dot_dimension_numbers<[2], [1], [1], [2], [0, 0, 0, 1, 1, 2], [0], [0]>} : vector<1x8x8xf32>, vector<1x8x16xf32>, vector<1x8x16xf32> -> vector<1x8x16xf32>
    "tpu.trace_stop"() : () -> ()
    %97 = vector.shape_cast %96 : vector<1x8x16xf32> to vector<8x16xf32>
    %98 = vector.extract_strided_slice %74 {offsets = [0, 16], sizes = [8, 16], strides = [1, 1]} : vector<8x32xf32> to vector<8x16xf32>
    %99 = vector.shape_cast %98 : vector<8x16xf32> to vector<1x8x16xf32>
    %100 = vector.extract_strided_slice %76 {offsets = [0, 16], sizes = [8, 16], strides = [1, 1]} : vector<8x32xf32> to vector<8x16xf32>
    %101 = vector.shape_cast %100 : vector<8x16xf32> to vector<1x8x16xf32>
    %102 = vector.extract_strided_slice %78 {offsets = [0, 16], sizes = [8, 16], strides = [1, 1]} : vector<8x32xf32> to vector<8x16xf32>
    %103 = vector.shape_cast %102 : vector<8x16xf32> to vector<1x8x16xf32>
    "tpu.trace_start"() <{level = 10 : i32, message = "bqd,bkd->bqk"}> : () -> ()
    %cst_42 = arith.constant dense<0.000000e+00> : vector<1x8x8xf32>
    %104 = tpu.matmul %99, %101, %cst_42 {dimension_numbers = #tpu.dot_dimension_numbers<[2], [2], [1], [1], [0, 0, 0, 1, 1, 1], [0], [0]>} : vector<1x8x16xf32>, vector<1x8x16xf32>, vector<1x8x8xf32> -> vector<1x8x8xf32>
    "tpu.trace_stop"() : () -> ()
    %cst_43 = arith.constant dense<0xFF800000> : vector<1x8xf32>
    %105 = vector.multi_reduction <maximumf>, %104, %cst_43 [2] : vector<1x8x8xf32> to vector<1x8xf32>
    %106 = vector.shape_cast %105 : vector<1x8xf32> to vector<1x8x1xf32>
    %107 = vector.broadcast %106 : vector<1x8x1xf32> to vector<1x8x8xf32>
    %108 = arith.subf %104, %107 : vector<1x8x8xf32>
    %109 = math.exp %108 : vector<1x8x8xf32>
    %cst_44 = arith.constant dense<0.000000e+00> : vector<1x8xf32>
    %110 = vector.multi_reduction <add>, %109, %cst_44 [2] : vector<1x8x8xf32> to vector<1x8xf32>
    %111 = vector.shape_cast %110 : vector<1x8xf32> to vector<1x8x1xf32>
    %112 = tpu.reciprocal %111 {approx = true} : vector<1x8x1xf32> -> vector<1x8x1xf32>
    %113 = vector.broadcast %112 : vector<1x8x1xf32> to vector<1x8x8xf32>
    %114 = arith.mulf %109, %113 : vector<1x8x8xf32>
    "tpu.trace_start"() <{level = 10 : i32, message = "bqk,bkd->bqd"}> : () -> ()
    %cst_45 = arith.constant dense<0.000000e+00> : vector<1x8x16xf32>
    %115 = tpu.matmul %114, %103, %cst_45 {dimension_numbers = #tpu.dot_dimension_numbers<[2], [1], [1], [2], [0, 0, 0, 1, 1, 2], [0], [0]>} : vector<1x8x8xf32>, vector<1x8x16xf32>, vector<1x8x16xf32> -> vector<1x8x16xf32>
    "tpu.trace_stop"() : () -> ()
    %116 = vector.shape_cast %115 : vector<1x8x16xf32> to vector<8x16xf32>
    %117 = tpu.concatenate %97, %116 in 1 : vector<8x16xf32>, vector<8x16xf32> -> vector<8x32xf32>
    %c0_46 = arith.constant 0 : index
    %c0_47 = arith.constant 0 : index
    %118 = vector.load %arg12[%c0_46, %c0_47] : memref<32x32xf32, #tpu.memory_space<vmem>>, vector<32x32xf32>
    %cst_48 = arith.constant dense<0.000000e+00> : vector<8x32xf32>
    %119 = tpu.matmul %117, %118, %cst_48 {dimension_numbers = #tpu.dot_dimension_numbers<[1], [0], [0], [1], [0, 0, 1, 1], [], []>} : vector<8x32xf32>, vector<32x32xf32>, vector<8x32xf32> -> vector<8x32xf32>
    %c0_49 = arith.constant 0 : index
    %c0_50 = arith.constant 0 : index
    %120 = vector.load %arg13[%c0_49, %c0_50] : memref<1x32xf32, #tpu.memory_space<vmem>>, vector<1x32xf32>
    %121 = vector.broadcast %120 : vector<1x32xf32> to vector<8x32xf32>
    %122 = arith.addf %119, %121 : vector<8x32xf32>
    %c0_51 = arith.constant 0 : index
    %c0_52 = arith.constant 0 : index
    %123 = vector.load %arg14[%c0_51, %c0_52] : memref<8x32xf32, #tpu.memory_space<vmem>>, vector<8x32xf32>
    tpu.vector_store %arg14[%c0_51, %c0_52], %122 {strides = array<i32>} : memref<8x32xf32, #tpu.memory_space<vmem>>, vector<8x32xf32>,
    return
  }
  func.func @transform_0(%arg0: i32) -> (i32, i32) {
    %c0_i32 = arith.constant 0 : i32
    %c0_i32_0 = arith.constant 0 : i32
    return %arg0, %c0_i32 : i32, i32
  }
  func.func @transform_1(%arg0: i32) -> (i32, i32, i32) {
    %c0_i32 = arith.constant 0 : i32
    %c0_i32_0 = arith.constant 0 : i32
    %c0_i32_1 = arith.constant 0 : i32
    return %arg0, %c0_i32, %c0_i32_0 : i32, i32, i32
  }
  func.func @transform_2(%arg0: i32) -> (i32, i32) {
    %c0_i32 = arith.constant 0 : i32
    %c0_i32_0 = arith.constant 0 : i32
    %c0_i32_1 = arith.constant 0 : i32
    return %c0_i32, %c0_i32_0 : i32, i32
  }
  func.func @transform_3(%arg0: i32) -> (i32, i32) {
    %c0_i32 = arith.constant 0 : i32
    %c0_i32_0 = arith.constant 0 : i32
    %c0_i32_1 = arith.constant 0 : i32
    return %c0_i32, %c0_i32_0 : i32, i32
  }
  func.func @transform_4(%arg0: i32) -> (i32, i32) {
    %c0_i32 = arith.constant 0 : i32
    %c0_i32_0 = arith.constant 0 : i32
    %c0_i32_1 = arith.constant 0 : i32
    return %c0_i32, %c0_i32_0 : i32, i32
  }
  func.func @transform_5(%arg0: i32) -> (i32, i32) {
    %c0_i32 = arith.constant 0 : i32
    %c0_i32_0 = arith.constant 0 : i32
    %c0_i32_1 = arith.constant 0 : i32
    return %c0_i32, %c0_i32_0 : i32, i32
  }
  func.func @transform_6(%arg0: i32) -> (i32, i32) {
    %c0_i32 = arith.constant 0 : i32
    %c0_i32_0 = arith.constant 0 : i32
    %c0_i32_1 = arith.constant 0 : i32
    return %c0_i32, %c0_i32_0 : i32, i32
  }
  func.func @transform_7(%arg0: i32) -> (i32, i32) {
    %c0_i32 = arith.constant 0 : i32
    %c0_i32_0 = arith.constant 0 : i32
    %c0_i32_1 = arith.constant 0 : i32
    return %c0_i32, %c0_i32_0 : i32, i32
  }
  func.func @transform_8(%arg0: i32) -> (i32, i32) {
    %c0_i32 = arith.constant 0 : i32
    %c0_i32_0 = arith.constant 0 : i32
    %c0_i32_1 = arith.constant 0 : i32
    return %c0_i32, %c0_i32_0 : i32, i32
  }
  func.func @transform_9(%arg0: i32) -> (i32, i32) {
    %c0_i32 = arith.constant 0 : i32
    %c0_i32_0 = arith.constant 0 : i32
    %c0_i32_1 = arith.constant 0 : i32
    return %c0_i32, %c0_i32_0 : i32, i32
  }
  func.func @transform_10(%arg0: i32) -> (i32, i32) {
    %c0_i32 = arith.constant 0 : i32
    %c0_i32_0 = arith.constant 0 : i32
    %c0_i32_1 = arith.constant 0 : i32
    return %c0_i32, %c0_i32_0 : i32, i32
  }
  func.func @transform_11(%arg0: i32) -> (i32, i32) {
    %c0_i32 = arith.constant 0 : i32
    %c0_i32_0 = arith.constant 0 : i32
    %c0_i32_1 = arith.constant 0 : i32
    return %c0_i32, %c0_i32_0 : i32, i32
  }
  func.func @transform_12(%arg0: i32) -> (i32, i32) {
    %c0_i32 = arith.constant 0 : i32
    %c0_i32_0 = arith.constant 0 : i32
    %c0_i32_1 = arith.constant 0 : i32
    return %c0_i32, %c0_i32_0 : i32, i32
  }
  func.func @transform_13(%arg0: i32) -> (i32, i32) {
    %c0_i32 = arith.constant 0 : i32
    %c0_i32_0 = arith.constant 0 : i32
    return %arg0, %c0_i32 : i32, i32
  }
}

module attributes {stable_mosaic.version = 11 : i64} {
  func.func @lga_kernel(%arg0: i32, %arg1: memref<8x32xf32, #tpu.memory_space<vmem>>, %arg2: memref<1x1x16xf32, #tpu.memory_space<vmem>>, %arg3: memref<1x32xf32, #tpu.memory_space<vmem>>, %arg4: memref<1x32xf32, #tpu.memory_space<vmem>>, %arg5: memref<1x16xf32, #tpu.memory_space<vmem>>, %arg6: memref<1x16xf32, #tpu.memory_space<vmem>>, %arg7: memref<16x32xf32, #tpu.memory_space<vmem>>, %arg8: memref<16x32xf32, #tpu.memory_space<vmem>>, %arg9: memref<32x32xf32, #tpu.memory_space<vmem>>, %arg10: memref<32x32xf32, #tpu.memory_space<vmem>>, %arg11: memref<32x32xf32, #tpu.memory_space<vmem>>, %arg12: memref<32x32xf32, #tpu.memory_space<vmem>>, %arg13: memref<1x32xf32, #tpu.memory_space<vmem>>, %arg14: memref<8x32xf32, #tpu.memory_space<vmem>>) attributes {dimension_semantics = [#tpu.dimension_semantics<parallel>], iteration_bounds = array<i64: 2>, scalar_prefetch = 0 : i64, scratch_operands = 0 : i64, tpu.core_type = #tpu.core_type<tc>, window_params = [{transform_indices = @transform_0, window_bounds = array<i64: 8, 32>}, {transform_indices = @transform_1, window_bounds = array<i64: 1, 1, 16>}, {pipeline_mode = #tpu.pipeline_mode<synchronous>, transform_indices = @transform_2, window_bounds = array<i64: 1, 32>}, {pipeline_mode = #tpu.pipeline_mode<synchronous>, transform_indices = @transform_3, window_bounds = array<i64: 1, 32>}, {pipeline_mode = #tpu.pipeline_mode<synchronous>, transform_indices = @transform_4, window_bounds = array<i64: 1, 16>}, {pipeline_mode = #tpu.pipeline_mode<synchronous>, transform_indices = @transform_5, window_bounds = array<i64: 1, 16>}, {pipeline_mode = #tpu.pipeline_mode<synchronous>, transform_indices = @transform_6, window_bounds = array<i64: 16, 32>}, {pipeline_mode = #tpu.pipeline_mode<synchronous>, transform_indices = @transform_7, window_bounds = array<i64: 16, 32>}, {pipeline_mode = #tpu.pipeline_mode<synchronous>, transform_indices = @transform_8, window_bounds = array<i64: 32, 32>}, {pipeline_mode = #tpu.pipeline_mode<synchronous>, transform_indices = @transform_9, window_bounds = array<i64: 32, 32>}, {pipeline_mode = #tpu.pipeline_mode<synchronous>, transform_indices = @transform_10, window_bounds = array<i64: 32, 32>}, {pipeline_mode = #tpu.pipeline_mode<synchronous>, transform_indices = @transform_11, window_bounds = array<i64: 32, 32>}, {pipeline_mode = #tpu.pipeline_mode<synchronous>, transform_indices = @transform_12, window_bounds = array<i64: 1, 32>}, {transform_indices = @transform_13, window_bounds = array<i64: 8, 32>}]} {
    %c0 = arith.constant 0 : index
    %c0_0 = arith.constant 0 : index
    %0 = vector.load %arg1[%c0, %c0_0] : memref<8x32xf32, #tpu.memory_space<vmem>>, vector<8x32xf32>
    %c0_1 = arith.constant 0 : index
    %c0_2 = arith.constant 0 : index
    %c0_3 = arith.constant 0 : index
    %1 = vector.load %arg2[%c0_1, %c0_2, %c0_3] : memref<1x1x16xf32, #tpu.memory_space<vmem>>, vector<1x1x16xf32>
    %2 = vector.shape_cast %1 : vector<1x1x16xf32> to vector<1x16xf32>
    %c0_4 = arith.constant 0 : index
    %c0_5 = arith.constant 0 : index
    %3 = vector.load %arg5[%c0_4, %c0_5] : memref<1x16xf32, #tpu.memory_space<vmem>>, vector<1x16xf32>
    %c0_6 = arith.constant 0 : index
    %c0_7 = arith.constant 0 : index
    %4 = vector.load %arg6[%c0_6, %c0_7] : memref<1x16xf32, #tpu.memory_space<vmem>>, vector<1x16xf32>
    %cst = arith.constant dense<0.000000e+00> : vector<1xf32>
    %5 = vector.multi_reduction <add>, %2, %cst [1] : vector<1x16xf32> to vector<1xf32>
    %6 = vector.shape_cast %5 : vector<1xf32> to vector<1x1xf32>
    %cst_8 = arith.constant 1.600000e+01 : f32
    %7 = vector.broadcast %cst_8 : f32 to vector<1x1xf32>
    %8 = arith.divf %6, %7 : vector<1x1xf32>
    %9 = vector.broadcast %8 : vector<1x1xf32> to vector<1x16xf32>
    %10 = arith.subf %2, %9 : vector<1x16xf32>
    %11 = arith.mulf %10, %10 : vector<1x16xf32>
    %cst_9 = arith.constant dense<0.000000e+00> : vector<1xf32>
    %12 = vector.multi_reduction <add>, %11, %cst_9 [1] : vector<1x16xf32> to vector<1xf32>
    %13 = vector.shape_cast %12 : vector<1xf32> to vector<1x1xf32>
    %cst_10 = arith.constant 1.600000e+01 : f32
    %14 = vector.broadcast %cst_10 : f32 to vector<1x1xf32>
    %15 = arith.divf %13, %14 : vector<1x1xf32>
    %16 = vector.broadcast %8 : vector<1x1xf32> to vector<1x16xf32>
    %17 = arith.subf %2, %16 : vector<1x16xf32>
    %cst_11 = arith.constant 9.99999974E-6 : f32
    %18 = vector.broadcast %cst_11 : f32 to vector<1x1xf32>
    %19 = arith.addf %15, %18 : vector<1x1xf32>
    %20 = math.rsqrt %19 : vector<1x1xf32>
    %21 = vector.broadcast %20 : vector<1x1xf32> to vector<1x16xf32>
    %22 = arith.mulf %17, %21 : vector<1x16xf32>
    %23 = arith.mulf %22, %3 : vector<1x16xf32>
    %24 = arith.addf %23, %4 : vector<1x16xf32>
    %c0_12 = arith.constant 0 : index
    %c0_13 = arith.constant 0 : index
    %25 = vector.load %arg7[%c0_12, %c0_13] : memref<16x32xf32, #tpu.memory_space<vmem>>, vector<16x32xf32>
    %cst_14 = arith.constant dense<0.000000e+00> : vector<1x32xf32>
    %26 = tpu.matmul %24, %25, %cst_14 {dimension_numbers = #tpu.dot_dimension_numbers<[1], [0], [0], [1], [0, 0, 1, 1], [], []>} : vector<1x16xf32>, vector<16x32xf32>, vector<1x32xf32> -> vector<1x32xf32>
    %c0_15 = arith.constant 0 : index
    %c0_16 = arith.constant 0 : index
    %27 = vector.load %arg8[%c0_15, %c0_16] : memref<16x32xf32, #tpu.memory_space<vmem>>, vector<16x32xf32>
    %cst_17 = arith.constant dense<0.000000e+00> : vector<1x32xf32>
    %28 = tpu.matmul %24, %27, %cst_17 {dimension_numbers = #tpu.dot_dimension_numbers<[1], [0], [0], [1], [0, 0, 1, 1], [], []>} : vector<1x16xf32>, vector<16x32xf32>, vector<1x32xf32> -> vector<1x32xf32>
    %29 = arith.negf %26 : vector<1x32xf32>
    %30 = math.exp %29 : vector<1x32xf32>
    %cst_18 = arith.constant 1.000000e+00 : f32
    %31 = vector.broadcast %cst_18 : f32 to vector<1x32xf32>
    %32 = arith.addf %31, %30 : vector<1x32xf32>
    %33 = arith.divf %31, %32 : vector<1x32xf32>
    %34 = arith.mulf %26, %33 : vector<1x32xf32>
    %35 = arith.negf %28 : vector<1x32xf32>
    %36 = math.exp %35 : vector<1x32xf32>
    %cst_19 = arith.constant 1.000000e+00 : f32
    %37 = vector.broadcast %cst_19 : f32 to vector<1x32xf32>
    %38 = arith.addf %37, %36 : vector<1x32xf32>
    %39 = arith.divf %37, %38 : vector<1x32xf32>
    %40 = arith.mulf %28, %39 : vector<1x32xf32>
    %c0_20 = arith.constant 0 : index
    %c0_21 = arith.constant 0 : index
    %41 = vector.load %arg3[%c0_20, %c0_21] : memref<1x32xf32, #tpu.memory_space<vmem>>, vector<1x32xf32>
    %c0_22 = arith.constant 0 : index
    %c0_23 = arith.constant 0 : index
    %42 = vector.load %arg4[%c0_22, %c0_23] : memref<1x32xf32, #tpu.memory_space<vmem>>, vector<1x32xf32>
    %cst_24 = arith.constant dense<0.000000e+00> : vector<8xf32>
    %43 = vector.multi_reduction <add>, %0, %cst_24 [1] : vector<8x32xf32> to vector<8xf32>
    %44 = vector.shape_cast %43 : vector<8xf32> to vector<8x1xf32>
    %cst_25 = arith.constant 3.200000e+01 : f32
    %45 = vector.broadcast %cst_25 : f32 to vector<8x1xf32>
    %46 = arith.divf %44, %45 : vector<8x1xf32>
    %47 = vector.broadcast %46 : vector<8x1xf32> to vector<8x32xf32>
    %48 = arith.subf %0, %47 : vector<8x32xf32>
    %49 = arith.mulf %48, %48 : vector<8x32xf32>
    %cst_26 = arith.constant dense<0.000000e+00> : vector<8xf32>
    %50 = vector.multi_reduction <add>, %49, %cst_26 [1] : vector<8x32xf32> to vector<8xf32>
    %51 = vector.shape_cast %50 : vector<8xf32> to vector<8x1xf32>
    %cst_27 = arith.constant 3.200000e+01 : f32
    %52 = vector.broadcast %cst_27 : f32 to vector<8x1xf32>
    %53 = arith.divf %51, %52 : vector<8x1xf32>
    %54 = vector.broadcast %46 : vector<8x1xf32> to vector<8x32xf32>
    %55 = arith.subf %0, %54 : vector<8x32xf32>
    %cst_28 = arith.constant 9.99999974E-6 : f32
    %56 = vector.broadcast %cst_28 : f32 to vector<8x1xf32>
    %57 = arith.addf %53, %56 : vector<8x1xf32>
    %58 = math.rsqrt %57 : vector<8x1xf32>
    %59 = vector.broadcast %58 : vector<8x1xf32> to vector<8x32xf32>
    %60 = arith.mulf %55, %59 : vector<8x32xf32>
    %61 = vector.broadcast %41 : vector<1x32xf32> to vector<8x32xf32>
    %62 = arith.mulf %60, %61 : vector<8x32xf32>
    %63 = vector.broadcast %42 : vector<1x32xf32> to vector<8x32xf32>
    %64 = arith.addf %62, %63 : vector<8x32xf32>
    %65 = vector.shape_cast %64 : vector<8x32xf32> to vector<1x8x32xf32>
    %66 = vector.shape_cast %34 : vector<1x32xf32> to vector<1x1x32xf32>
    %67 = vector.broadcast %66 : vector<1x1x32xf32> to vector<1x8x32xf32>
    %68 = arith.mulf %65, %67 : vector<1x8x32xf32>
    %69 = vector.shape_cast %40 : vector<1x32xf32> to vector<1x1x32xf32>
    %70 = vector.broadcast %69 : vector<1x1x32xf32> to vector<1x8x32xf32>
    %71 = arith.addf %68, %70 : vector<1x8x32xf32>
    %72 = vector.shape_cast %71 : vector<1x8x32xf32> to vector<8x32xf32>
    %c0_29 = arith.constant 0 : index
    %c0_30 = arith.constant 0 : index
    %73 = vector.load %arg9[%c0_29, %c0_30] : memref<32x32xf32, #tpu.memory_space<vmem>>, vector<32x32xf32>
    %cst_31 = arith.constant dense<0.000000e+00> : vector<8x32xf32>
    %74 = tpu.matmul %72, %73, %cst_31 {dimension_numbers = #tpu.dot_dimension_numbers<[1], [0], [0], [1], [0, 0, 1, 1], [], []>} : vector<8x32xf32>, vector<32x32xf32>, vector<8x32xf32> -> vector<8x32xf32>
    %c0_32 = arith.constant 0 : index
    %c0_33 = arith.constant 0 : index
    %75 = vector.load %arg10[%c0_32, %c0_33] : memref<32x32xf32, #tpu.memory_space<vmem>>, vector<32x32xf32>
    %cst_34 = arith.constant dense<0.000000e+00> : vector<8x32xf32>
    %76 = tpu.matmul %72, %75, %cst_34 {dimension_numbers = #tpu.dot_dimension_numbers<[1], [0], [0], [1], [0, 0, 1, 1], [], []>} : vector<8x32xf32>, vector<32x32xf32>, vector<8x32xf32> -> vector<8x32xf32>
    %c0_35 = arith.constant 0 : index
    %c0_36 = arith.constant 0 : index
    %77 = vector.load %arg11[%c0_35, %c0_36] : memref<32x32xf32, #tpu.memory_space<vmem>>, vector<32x32xf32>
    %cst_37 = arith.constant dense<0.000000e+00> : vector<8x32xf32>
    %78 = tpu.matmul %72, %77, %cst_37 {dimension_numbers = #tpu.dot_dimension_numbers<[1], [0], [0], [1], [0, 0, 1, 1], [], []>} : vector<8x32xf32>, vector<32x32xf32>, vector<8x32xf32> -> vector<8x32xf32>
    %79 = vector.extract_strided_slice %74 {offsets = [0, 0], sizes = [8, 16], strides = [1, 1]} : vector<8x32xf32> to vector<8x16xf32>
    %80 = vector.shape_cast %79 : vector<8x16xf32> to vector<1x8x16xf32>
    %81 = vector.extract_strided_slice %76 {offsets = [0, 0], sizes = [8, 16], strides = [1, 1]} : vector<8x32xf32> to vector<8x16xf32>
    %82 = vector.shape_cast %81 : vector<8x16xf32> to vector<1x8x16xf32>
    %83 = vector.extract_strided_slice %78 {offsets = [0, 0], sizes = [8, 16], strides = [1, 1]} : vector<8x32xf32> to vector<8x16xf32>
    %84 = vector.shape_cast %83 : vector<8x16xf32> to vector<1x8x16xf32>
    "tpu.trace_start"() <{level = 10 : i32, message = "bqd,bkd->bqk"}> : () -> ()
    %cst_38 = arith.constant dense<0.000000e+00> : vector<1x8x8xf32>
    %85 = tpu.matmul %80, %82, %cst_38 {dimension_numbers = #tpu.dot_dimension_numbers<[2], [2], [1], [1], [0, 0, 0, 1, 1, 1], [0], [0]>} : vector<1x8x16xf32>, vector<1x8x16xf32>, vector<1x8x8xf32> -> vector<1x8x8xf32>
    "tpu.trace_stop"() : () -> ()
    %cst_39 = arith.constant dense<0xFF800000> : vector<1x8xf32>
    %86 = vector.multi_reduction <maximumf>, %85, %cst_39 [2] : vector<1x8x8xf32> to vector<1x8xf32>
    %87 = vector.shape_cast %86 : vector<1x8xf32> to vector<1x8x1xf32>
    %88 = vector.broadcast %87 : vector<1x8x1xf32> to vector<1x8x8xf32>
    %89 = arith.subf %85, %88 : vector<1x8x8xf32>
    %90 = math.exp %89 : vector<1x8x8xf32>
    %cst_40 = arith.constant dense<0.000000e+00> : vector<1x8xf32>
    %91 = vector.multi_reduction <add>, %90, %cst_40 [2] : vector<1x8x8xf32> to vector<1x8xf32>
    %92 = vector.shape_cast %91 : vector<1x8xf32> to vector<1x8x1xf32>
    %93 = tpu.reciprocal %92 {approx = true} : vector<1x8x1xf32> -> vector<1x8x1xf32>
    %94 = vector.broadcast %93 : vector<1x8x1xf32> to vector<1x8x8xf32>
    %95 = arith.mulf %90, %94 : vector<1x8x8xf32>
    "tpu.trace_start"() <{level = 10 : i32, message = "bqk,bkd->bqd"}> : () -> ()
    %cst_41 = arith.constant dense<0.000000e+00> : vector<1x8x16xf32>
    %96 = tpu.matmul %95, %84, %cst_41 {dimension_numbers = #tpu.dot_dimension_numbers<[2], [1], [1], [2], [0, 0, 0, 1, 1, 2], [0], [0]>} : vector<1x8x8xf32>, vector<1x8x16xf32>, vector<1x8x16xf32> -> vector<1x8x16xf32>
    "tpu.trace_stop"() : () -> ()
    %97 = vector.shape_cast %96 : vector<1x8x16xf32> to vector<8x16xf32>
    %98 = vector.extract_strided_slice %74 {offsets = [0, 16], sizes = [8, 16], strides = [1, 1]} : vector<8x32xf32> to vector<8x16xf32>
    %99 = vector.shape_cast %98 : vector<8x16xf32> to vector<1x8x16xf32>
    %100 = vector.extract_strided_slice %76 {offsets = [0, 16], sizes = [8, 16], strides = [1, 1]} : vector<8x32xf32> to vector<8x16xf32>
    %101 = vector.shape_cast %100 : vector<8x16xf32> to vector<1x8x16xf32>
    %102 = vector.extract_strided_slice %78 {offsets = [0, 16], sizes = [8, 16], strides = [1, 1]} : vector<8x32xf32> to vector<8x16xf32>
    %103 = vector.shape_cast %102 : vector<8x16xf32> to vector<1x8x16xf32>
    "tpu.trace_start"() <{level = 10 : i32, message = "bqd,bkd->bqk"}> : () -> ()
    %cst_42 = arith.constant dense<0.000000e+00> : vector<1x8x8xf32>
    %104 = tpu.matmul %99, %101, %cst_42 {dimension_numbers = #tpu.dot_dimension_numbers<[2], [2], [1], [1], [0, 0, 0, 1, 1, 1], [0], [0]>} : vector<1x8x16xf32>, vector<1x8x16xf32>, vector<1x8x8xf32> -> vector<1x8x8xf32>
    "tpu.trace_stop"() : () -> ()
    %cst_43 = arith.constant dense<0xFF800000> : vector<1x8xf32>
    %105 = vector.multi_reduction <maximumf>, %104, %cst_43 [2] : vector<1x8x8xf32> to vector<1x8xf32>
    %106 = vector.shape_cast %105 : vector<1x8xf32> to vector<1x8x1xf32>
    %107 = vector.broadcast %106 : vector<1x8x1xf32> to vector<1x8x8xf32>
    %108 = arith.subf %104, %107 : vector<1x8x8xf32>
    %109 = math.exp %108 : vector<1x8x8xf32>
    %cst_44 = arith.constant dense<0.000000e+00> : vector<1x8xf32>
    %110 = vector.multi_reduction <add>, %109, %cst_44 [2] : vector<1x8x8xf32> to vector<1x8xf32>
    %111 = vector.shape_cast %110 : vector<1x8xf32> to vector<1x8x1xf32>
    %112 = tpu.reciprocal %111 {approx = true} : vector<1x8x1xf32> -> vector<1x8x1xf32>
    %113 = vector.broadcast %112 : vector<1x8x1xf32> to vector<1x8x8xf32>
    %114 = arith.mulf %109, %113 : vector<1x8x8xf32>
    "tpu.trace_start"() <{level = 10 : i32, message = "bqk,bkd->bqd"}> : () -> ()
    %cst_45 = arith.constant dense<0.000000e+00> : vector<1x8x16xf32>
    %115 = tpu.matmul %114, %103, %cst_45 {dimension_numbers = #tpu.dot_dimension_numbers<[2], [1], [1], [2], [0, 0, 0, 1, 1, 2], [0], [0]>} : vector<1x8x8xf32>, vector<1x8x16xf32>, vector<1x8x16xf32> -> vector<1x8x16xf32>
    "tpu.trace_stop"() : () -> ()
    %116 = vector.shape_cast %115 : vector<1x8x16xf32> to vector<8x16xf32>
    %117 = tpu.concatenate %97, %116 in 1 : vector<8x16xf32>, vector<8x16xf32> -> vector<8x32xf32>
    %c0_46 = arith.constant 0 : index
    %c0_47 = arith.constant 0 : index
    %118 = vector.load %arg12[%c0_46, %c0_47] : memref<32x32xf32, #tpu.memory_space<vmem>>, vector<32x32xf32>
    %cst_48 = arith.constant dense<0.000000e+00> : vector<8x32xf32>
    %119 = tpu.matmul %117, %118, %cst_48 {dimension_numbers = #tpu.dot_dimension_numbers<[1], [0], [0], [1], [0, 0, 1, 1], [], []>} : vector<8x32xf32>, vector<32x32xf32>, vector<8x32xf32> -> vector<8x32xf32>
    %c0_49 = arith.constant 0 : index
    %c0_50 = arith.constant 0 : index
    %120 = vector.load %arg13[%c0_49, %c0_50] : memref<1x32xf32, #tpu.memory_space<vmem>>, vector<1x32xf32>
    %121 = vector.broadcast %120 : vector<1x32xf32> to vector<8x32xf32>
    %122 = arith.addf %119, %121 : vector<8x32xf32>
    %c0_51 = arith.constant 0 : index
    %c0_52 = arith.constant 0 : index
    %123 = vector.load %arg14[%c0_51, %c0_52] : memref<8x32xf32, #tpu.memory_space<vmem>>, vector<8x32xf32>
    tpu.vector_store %arg14[%c0_51, %c0_52], %122 {strides = array<i32>} : memref<8x32xf32, #tpu.memory_space<vmem>>, vector<8x32xf32>,
    return
  }
  func.func @transform_0(%arg0: i32) -> (i32, i32) {
    %c0_i32 = arith.constant 0 : i32
    %c0_i32_0 = arith.constant 0 : i32
    return %arg0, %c0_i32 : i32, i32
  }
  func.func @transform_1(%arg0: i32) -> (i32, i32, i32) {
    %c0_i32 = arith.constant 0 : i32
    %c0_i32_0 = arith.constant 0 : i32
    %c0_i32_1 = arith.constant 0 : i32
    return %arg0, %c0_i32, %c0_i32_0 : i32, i32, i32
  }
  func.func @transform_2(%arg0: i32) -> (i32, i32) {
    %c0_i32 = arith.constant 0 : i32
    %c0_i32_0 = arith.constant 0 : i32
    %c0_i32_1 = arith.constant 0 : i32
    return %c0_i32, %c0_i32_0 : i32, i32
  }
  func.func @transform_3(%arg0: i32) -> (i32, i32) {
    %c0_i32 = arith.constant 0 : i32
    %c0_i32_0 = arith.constant 0 : i32
    %c0_i32_1 = arith.constant 0 : i32
    return %c0_i32, %c0_i32_0 : i32, i32
  }
  func.func @transform_4(%arg0: i32) -> (i32, i32) {
    %c0_i32 = arith.constant 0 : i32
    %c0_i32_0 = arith.constant 0 : i32
    %c0_i32_1 = arith.constant 0 : i32
    return %c0_i32, %c0_i32_0 : i32, i32
  }
  func.func @transform_5(%arg0: i32) -> (i32, i32) {
    %c0_i32 = arith.constant 0 : i32
    %c0_i32_0 = arith.constant 0 : i32
    %c0_i32_1 = arith.constant 0 : i32
    return %c0_i32, %c0_i32_0 : i32, i32
  }
  func.func @transform_6(%arg0: i32) -> (i32, i32) {
    %c0_i32 = arith.constant 0 : i32
    %c0_i32_0 = arith.constant 0 : i32
    %c0_i32_1 = arith.constant 0 : i32
    return %c0_i32, %c0_i32_0 : i32, i32
  }
  func.func @transform_7(%arg0: i32) -> (i32, i32) {
    %c0_i32 = arith.constant 0 : i32
    %c0_i32_0 = arith.constant 0 : i32
    %c0_i32_1 = arith.constant 0 : i32
    return %c0_i32, %c0_i32_0 : i32, i32
  }
  func.func @transform_8(%arg0: i32) -> (i32, i32) {
    %c0_i32 = arith.constant 0 : i32
    %c0_i32_0 = arith.constant 0 : i32
    %c0_i32_1 = arith.constant 0 : i32
    return %c0_i32, %c0_i32_0 : i32, i32
  }
  func.func @transform_9(%arg0: i32) -> (i32, i32) {
    %c0_i32 = arith.constant 0 : i32
    %c0_i32_0 = arith.constant 0 : i32
    %c0_i32_1 = arith.constant 0 : i32
    return %c0_i32, %c0_i32_0 : i32, i32
  }
  func.func @transform_10(%arg0: i32) -> (i32, i32) {
    %c0_i32 = arith.constant 0 : i32
    %c0_i32_0 = arith.constant 0 : i32
    %c0_i32_1 = arith.constant 0 : i32
    return %c0_i32, %c0_i32_0 : i32, i32
  }
  func.func @transform_11(%arg0: i32) -> (i32, i32) {
    %c0_i32 = arith.constant 0 : i32
    %c0_i32_0 = arith.constant 0 : i32
    %c0_i32_1 = arith.constant 0 : i32
    return %c0_i32, %c0_i32_0 : i32, i32
  }
  func.func @transform_12(%arg0: i32) -> (i32, i32) {
    %c0_i32 = arith.constant 0 : i32
    %c0_i32_0 = arith.constant 0 : i32
    %c0_i32_1 = arith.constant 0 : i32
    return %c0_i32, %c0_i32_0 : i32, i32
  }
  func.func @transform_13(%arg0: i32) -> (i32, i32) {
    %c0_i32 = arith.constant 0 : i32
    %c0_i32_0 = arith.constant 0 : i32
    return %arg0, %c0_i32 : i32, i32
  }
}

</mosaic_0001>

<bundles_post_ra>
// kernel: tpu_custom_call.1
= control target key start
LH: loop header
LB: loop body
LE: loop exit
PB: predicated region body
PF: predicated region fallthrough
CT: control target
= control target key end

     0   :  { %s2930_s0 = inlined_call_operand.hbm [shape: f32[16,32], index: 0, kind: input, shape index: {}]   ;;  %s2931_s1 = inlined_call_operand.vmem [shape: f32[2,1,16], index: 1, kind: input, shape index: {}]   ;;  %s2932_s2 = inlined_call_operand.hbm [shape: f32[1,32], index: 2, kind: input, shape index: {}]   ;;  %s2933_s3 = inlined_call_operand.hbm [shape: f32[1,32], index: 3, kind: input, shape index: {}]   ;;  %s2934_s4 = inlined_call_operand.hbm [shape: f32[1,16], index: 4, kind: input, shape index: {}]   ;;  %s2935_s5 = inlined_call_operand.hbm [shape: f32[1,16], index: 5, kind: input, shape index: {}]   ;;  %s2936_s6 = inlined_call_operand.hbm [shape: f32[16,32], index: 6, kind: input, shape index: {}]   ;;  %s2937_s7 = inlined_call_operand.hbm [shape: f32[16,32], index: 7, kind: input, shape index: {}]   ;;  %s2938_s8 = inlined_call_operand.hbm [shape: f32[32,32], index: 8, kind: input, shape index: {}]   ;;  %s2939_s9 = inlined_call_operand.vmem [shape: f32[32,32], index: 9, kind: input, shape index: {}]   ;;  %s2940_s10 = inlined_call_operand.hbm [shape: f32[32,32], index: 10, kind: input, shape index: {}]   ;;  %s2941_s11 = inlined_call_operand.hbm [shape: f32[32,32], index: 11, kind: input, shape index: {}]   ;;  %s2942_s12 = inlined_call_operand.vmem [shape: f32[1,32], index: 12, kind: input, shape index: {}]   ;;  %s2943_s13 = inlined_call_operand.hbm [shape: f32[16,32], index: 13, kind: output, shape index: {}]  }
   0x1   :  { %2950 = sst [smem:[#allocation28_spill]] %s2931_s1 }
   0x2   :  { %2951 = sst [smem:[#allocation29_spill]] %s2932_s2 }
   0x3   :  { %2952 = sst [smem:[#allocation30_spill]] %s2934_s4 }
   0x4   :  { %2953 = sst [smem:[#allocation31_spill]] %s2939_s9 }
   0x5   :  { %2954 = sst [smem:[#allocation32_spill]] %s2942_s12 }
   0x6   :  { %2955 = sst [smem:[#allocation33_spill]] %s2943_s13 }
   0x7   :  { %18 = vsyncpa [#allocation3], 0 }
   0x8   :  { %20 = vsyncpa [#allocation3 + $0x1], 0 }
   0x9   :  { %21 = vsyncpa [#allocation6], 0 }
   0xa   :  { %22 = vsyncpa [#allocation9], 0 }
   0xb   :  { %23 = vsyncpa [#allocation12], 0 }
   0xc   :  { %24 = vsyncpa [#allocation15], 0 }
   0xd   :  { %25 = vsyncpa [#allocation18], 0 }
   0xe   :  { %26 = vsyncpa [#allocation4], 0 }
   0xf   :  { %28 = vsyncpa [#allocation4 + $0x1], 0  ;;  %s2449_s25 = smov 0   ;;  %s2451_s26 = smov 0  }
  0x10   :  { %s2453_s27 = smov 0   ;;  %s2455_s28 = smov 0  }
  0x11 LB: > { %s2361_s29 = smov [#allocation5]   ;;  %s2470_s14 = sadd.s32 4294967295, %s2359_s28   ;;  %s2359_s28 = sphi %s2455_s28, %s2989_s28   ;;  %s2355_s27 = sphi %s2453_s27, %s2988_s27   ;;  %s2351_s26 = sphi %s2451_s26, %s2987_s26   ;;  %s2347_s25 = sphi %s2449_s25, %s2986_s25  }
  0x12   : > { %s361_s30 = sshll.u32 %s2361_s29, 4  ;;  %p1639_p0 = scmp.ge.s32.totalorder %s2359_s28, 1  ;;  %s2475_s30 = int_to_ptr.vmem [resolvable:$true] %s361_s30 }
  0x13   : > { %p2947_p1 = scmp.eq.s32.totalorder %s2470_s14, 0  ;;  %p348_p2 = scmp.lt.s32.totalorder %s2359_s28, 3 }
  0x14   : > { %s2362_s16 = smov [#allocation8]   ;;  %s2363_s18 = smov [#allocation11]  }
  0x15   : > { %p2477_p3 = pnand %p1639_p0, %p348_p2  ;;  %s383_s17 = sshll.u32 %s2362_s16, 4  ;;  %s2484_s17 = int_to_ptr.vmem [resolvable:$true] %s383_s17 }
  0x16   : > { %s404_s19 = sshll.u32 %s2363_s18, 4  ;;  %s2959_s2 = sld [smem:[#allocation29_spill]]  ;;  %s2492_s19 = int_to_ptr.vmem [resolvable:$true] %s404_s19 }
  0x17   : > { %s2956_s15 = scalar_select %p2477_p3, 1, 0 }
  0x18   : > { %p1867_p5 = pneg %p2477_p3 }
  0x19   : > { %2957 = sst [smem:[#allocation27_spill]] %s2956_s15 }
  0x1a   : > { %p2488_p6 = pnand %p1867_p5, %p2947_p1 }
  0x1c   : > { %s1991_s23 = scalar_lea.hbm %s2959_s2, 16  ;;  %p2502_p8 = pneg %p2488_p6 }
  0x1d   : > { %p1992_p7 = scmp.ne.s32.totalorder %s2959_s2, %s1991_s23  ;;  %p1998_p11 = scmp.lt.u32.totalorder %s1991_s23, %s2959_s2 }
  0x1f   : > { %p1994_p9 = pnand %p2502_p8, %p1992_p7 }
  0x21   : > { %p1995_p10 = pneg %p1994_p9 }
  0x23   : > { %p2000_p12 = pnand %p1998_p11, %p1995_p10 }
  0x25   : > { %2003 = shalt.err (!%p2000_p12)
}
  0x26   : > { %s2004_s21 = scalar_lea.vmem %s2475_s30, 16  ;;  %s2011_s22 = scalar_lea.vmem %s2475_s30, 32 }
  0x27   : > { %p2005_p13 = scmp.ne.s32.totalorder %s2475_s30, %s2004_s21  ;;  %p2012_p5 = scmp.lt.s32.totalorder %s2475_s30, %s2475_s30 }
  0x28   : > { %p2013_p7 = scmp.lt.s32.totalorder %s2011_s22, %s2004_s21 }
  0x29   : > { %p2007_p0 = pnand %p2005_p13, %p2502_p8 }
  0x2a   : > { %p2014_p9 = por %p2013_p7, %p2012_p5 }
  0x2b   : > { %p2008_p2 = pneg %p2007_p0 }
  0x2d   : > { %p2015_p4 = pnand %p2014_p9, %p2008_p2 }
  0x2f   : > { %2018 = shalt.err (!%p2015_p4)
}
  0x30   : > { %1870 = dma.hbm_to_vmem [thread:$0]  (!%p2488_p6), %s2959_s2, 16, %s2475_s30, [#allocation6]  }
  0x31   : > { %s2961_s4 = sld [smem:[#allocation30_spill]] }
  0x37   : > { %s2019_s18 = scalar_lea.hbm %s2961_s4, 16 }
  0x38   : > { %p2020_p10 = scmp.ne.s32.totalorder %s2961_s4, %s2019_s18  ;;  %p2026_p4 = scmp.lt.u32.totalorder %s2019_s18, %s2961_s4 }
  0x3a   : > { %p2022_p11 = pnand %p2020_p10, %p2502_p8 }
  0x3c   : > { %p2023_p12 = pneg %p2022_p11 }
  0x3e   : > { %p2028_p13 = pnand %p2026_p4, %p2023_p12 }
  0x40   : > { %2031 = shalt.err (!%p2028_p13)
}
  0x41   : > { %s2032_s30 = scalar_lea.vmem %s2484_s17, 16  ;;  %s2039_s9 = scalar_lea.vmem %s2484_s17, 32 }
  0x42   : > { %p2033_p0 = scmp.ne.s32.totalorder %s2484_s17, %s2032_s30  ;;  %p2040_p7 = scmp.lt.s32.totalorder %s2484_s17, %s2484_s17 }
  0x43   : > { %p2041_p9 = scmp.lt.s32.totalorder %s2039_s9, %s2032_s30 }
  0x44   : > { %p2035_p2 = pnand %p2033_p0, %p2502_p8 }
  0x45   : > { %p2042_p10 = por %p2041_p9, %p2040_p7 }
  0x46   : > { %p2036_p5 = pneg %p2035_p2 }
  0x48   : > { %p2043_p11 = pnand %p2042_p10, %p2036_p5 }
  0x4a   : > { %2046 = shalt.err (!%p2043_p11)
}
  0x4b   : > { %1876 = dma.hbm_to_vmem [thread:$0]  (!%p2488_p6), %s2961_s4, 16, %s2484_s17, [#allocation9]  }
  0x4c   : > { %s2047_s29 = scalar_lea.hbm %s2936_s6, 256 }
  0x4d   : > { %p2048_p12 = scmp.ne.s32.totalorder %s2936_s6, %s2047_s29  ;;  %p2054_p0 = scmp.lt.u32.totalorder %s2047_s29, %s2936_s6 }
  0x4f   : > { %p2050_p4 = pnand %p2048_p12, %p2502_p8 }
  0x51   : > { %p2051_p13 = pneg %p2050_p4 }
  0x53   : > { %p2056_p2 = pnand %p2054_p0, %p2051_p13 }
  0x55   : > { %2059 = shalt.err (!%p2056_p2)
}
  0x56   : > { %s2060_s17 = scalar_lea.vmem %s2492_s19, 256  ;;  %p2068_p10 = scmp.lt.s32.totalorder %s2492_s19, %s2492_s19 }
  0x57   : > { %p2061_p5 = scmp.ne.s32.totalorder %s2492_s19, %s2060_s17  ;;  %p2069_p11 = scmp.lt.s32.totalorder %s2060_s17, %s2060_s17 }
  0x59   : > { %p2063_p7 = pnand %p2061_p5, %p2502_p8  ;;  %p2070_p12 = por %p2069_p11, %p2068_p10 }
  0x5b   : > { %p2064_p9 = pneg %p2063_p7 }
  0x5d   : > { %p2071_p4 = pnand %p2070_p12, %p2064_p9 }
  0x5f   : > { %2074 = shalt.err (!%p2071_p4)
}
  0x60   : > { %s2364_s9 = smov 128   ;;  %s2365_s12 = smov 8  }
  0x61   : > { %1882 = dma.hbm_to_vmem [thread:$0]  (!%p2488_p6), %s2936_s6, 256, %s2492_s19, [#allocation12], %s2364_s9, %s2364_s9, %s2365_s12  }
  0x62   : > { %s2366_s24 = smov [#allocation14]   ;;  %s2367_s18 = smov [#allocation7]  }
  0x63   : > { %s430_s29 = sshll.u32 %s2366_s24, 4  ;;  %s372_s21 = sshll.u32 %s2367_s18, 4  ;;  %s431_s29 = int_to_ptr.vmem [resolvable:$true] %s430_s29  ;;  %s373_s21 = int_to_ptr.vmem [resolvable:$true] %s372_s21 }
  0x64   : > { %s2075_s17 = scalar_lea.hbm %s2938_s8, 512 }
  0x65   : > { %p2076_p13 = scmp.ne.s32.totalorder %s2938_s8, %s2075_s17  ;;  %p2082_p5 = scmp.lt.u32.totalorder %s2075_s17, %s2938_s8 }
  0x67   : > { %p2078_p0 = pnand %p2076_p13, %p2502_p8 }
  0x69   : > { %p2079_p2 = pneg %p2078_p0 }
  0x6b   : > { %p2084_p7 = pnand %p2082_p5, %p2079_p2 }
  0x6d   : > { %2087 = shalt.err (!%p2084_p7)
}
  0x6e   : > { %s2088_s19 = scalar_lea.vmem %s431_s29, 512  ;;  %p2096_p12 = scmp.lt.s32.totalorder %s431_s29, %s431_s29 }
  0x6f   : > { %p2089_p9 = scmp.ne.s32.totalorder %s431_s29, %s2088_s19  ;;  %p2097_p4 = scmp.lt.s32.totalorder %s2088_s19, %s2088_s19 }
  0x71   : > { %p2091_p10 = pnand %p2089_p9, %p2502_p8  ;;  %p2098_p1 = por %p2097_p4, %p2096_p12 }
  0x73   : > { %p2092_p11 = pneg %p2091_p10 }
  0x75   : > { %p2099_p3 = pnand %p2098_p1, %p2092_p11 }
  0x77   : > { %2102 = shalt.err (!%p2099_p3)
}
  0x78   : > { %1888 = dma.hbm_to_vmem [thread:$0]  (!%p2488_p6), %s2938_s8, 512, %s431_s29, [#allocation15], %s2364_s9, %s2364_s9, %s2365_s12  }
  0x79   : > { %s2103_s13 = scalar_lea.hbm %s2933_s3, 16 }
  0x7a   : > { %p2104_p1 = scmp.ne.s32.totalorder %s2933_s3, %s2103_s13  ;;  %p2110_p0 = scmp.lt.u32.totalorder %s2103_s13, %s2933_s3 }
  0x7c   : > { %p2106_p3 = pnand %p2104_p1, %p2502_p8 }
  0x7e   : > { %p2107_p13 = pneg %p2106_p3 }
  0x80   : > { %p2112_p2 = pnand %p2110_p0, %p2107_p13 }
  0x82   : > { %2115 = shalt.err (!%p2112_p2)
}
  0x83   : > { %s2116_s30 = scalar_lea.vmem %s373_s21, 16  ;;  %s2123_s29 = scalar_lea.vmem %s373_s21, 32 }
  0x84   : > { %p2117_p5 = scmp.ne.s32.totalorder %s373_s21, %s2116_s30  ;;  %p2124_p10 = scmp.lt.s32.totalorder %s373_s21, %s373_s21 }
  0x85   : > { %p2125_p11 = scmp.lt.s32.totalorder %s2123_s29, %s2116_s30 }
  0x86   : > { %p2119_p7 = pnand %p2117_p5, %p2502_p8 }
  0x87   : > { %p2126_p12 = por %p2125_p11, %p2124_p10 }
  0x88   : > { %p2120_p9 = pneg %p2119_p7 }
  0x8a   : > { %p2127_p4 = pnand %p2126_p12, %p2120_p9 }
  0x8c   : > { %2130 = shalt.err (!%p2127_p4)
}
  0x8d   : > { %1873 = dma.hbm_to_vmem [thread:$0]  (!%p2488_p6), %s2933_s3, 16, %s373_s21, [#allocation6]  }
  0x8e   : > { %s2368_s1 = smov [#allocation10]   ;;  %s2369_s4 = smov [#allocation13]  }
  0x8f   : > { %s394_s2 = sshll.u32 %s2368_s1, 4  ;;  %s417_s15 = sshll.u32 %s2369_s4, 4  ;;  %s395_s2 = int_to_ptr.vmem [resolvable:$true] %s394_s2  ;;  %s418_s15 = int_to_ptr.vmem [resolvable:$true] %s417_s15 }
  0x90   : > { %s2131_s24 = scalar_lea.hbm %s2935_s5, 16 }
  0x91   : > { %p2132_p1 = scmp.ne.s32.totalorder %s2935_s5, %s2131_s24  ;;  %p2138_p0 = scmp.lt.u32.totalorder %s2131_s24, %s2935_s5 }
  0x93   : > { %p2134_p3 = pnand %p2132_p1, %p2502_p8 }
  0x95   : > { %p2135_p13 = pneg %p2134_p3 }
  0x97   : > { %p2140_p2 = pnand %p2138_p0, %p2135_p13 }
  0x99   : > { %2143 = shalt.err (!%p2140_p2)
}
  0x9a   : > { %s2144_s21 = scalar_lea.vmem %s395_s2, 16  ;;  %s2151_s17 = scalar_lea.vmem %s395_s2, 32 }
  0x9b   : > { %p2145_p5 = scmp.ne.s32.totalorder %s395_s2, %s2144_s21  ;;  %p2152_p10 = scmp.lt.s32.totalorder %s395_s2, %s395_s2 }
  0x9c   : > { %p2153_p11 = scmp.lt.s32.totalorder %s2151_s17, %s2144_s21 }
  0x9d   : > { %p2147_p7 = pnand %p2145_p5, %p2502_p8 }
  0x9e   : > { %p2154_p12 = por %p2153_p11, %p2152_p10 }
  0x9f   : > { %p2148_p9 = pneg %p2147_p7 }
  0xa1   : > { %p2155_p4 = pnand %p2154_p12, %p2148_p9 }
  0xa3   : > { %2158 = shalt.err (!%p2155_p4)
}
  0xa4   : > { %1879 = dma.hbm_to_vmem [thread:$0]  (!%p2488_p6), %s2935_s5, 16, %s395_s2, [#allocation9]  }
  0xa5   : > { %s2159_s23 = scalar_lea.hbm %s2937_s7, 256 }
  0xa6   : > { %p2160_p1 = scmp.ne.s32.totalorder %s2937_s7, %s2159_s23  ;;  %p2166_p0 = scmp.lt.u32.totalorder %s2159_s23, %s2937_s7 }
  0xa8   : > { %p2162_p3 = pnand %p2160_p1, %p2502_p8 }
  0xaa   : > { %p2163_p13 = pneg %p2162_p3 }
  0xac   : > { %p2168_p2 = pnand %p2166_p0, %p2163_p13 }
  0xae   : > { %2171 = shalt.err (!%p2168_p2)
}
  0xaf   : > { %s2172_s29 = scalar_lea.vmem %s418_s15, 256  ;;  %p2180_p10 = scmp.lt.s32.totalorder %s418_s15, %s418_s15 }
  0xb0   : > { %p2173_p5 = scmp.ne.s32.totalorder %s418_s15, %s2172_s29  ;;  %p2181_p11 = scmp.lt.s32.totalorder %s2172_s29, %s2172_s29 }
  0xb2   : > { %p2175_p7 = pnand %p2173_p5, %p2502_p8  ;;  %p2182_p12 = por %p2181_p11, %p2180_p10 }
  0xb4   : > { %p2176_p9 = pneg %p2175_p7 }
  0xb6   : > { %p2183_p4 = pnand %p2182_p12, %p2176_p9 }
  0xb8   : > { %2186 = shalt.err (!%p2183_p4)
}
  0xb9   : > { %1885 = dma.hbm_to_vmem [thread:$0]  (!%p2488_p6), %s2937_s7, 256, %s418_s15, [#allocation12], %s2364_s9, %s2364_s9, %s2365_s12  }
  0xba   : > { %s2370_s17 = smov [#allocation16]   ;;  %s2371_s1 = smov [#allocation17]  }
  0xbb   : > { %s446_s19 = sshll.u32 %s2370_s17, 4  ;;  %s459_s4 = sshll.u32 %s2371_s1, 4  ;;  %s447_s19 = int_to_ptr.vmem [resolvable:$true] %s446_s19  ;;  %s460_s4 = int_to_ptr.vmem [resolvable:$true] %s459_s4 }
  0xbc   : > { %s2187_s24 = scalar_lea.hbm %s2940_s10, 512 }
  0xbd   : > { %p2188_p1 = scmp.ne.s32.totalorder %s2940_s10, %s2187_s24  ;;  %p2194_p0 = scmp.lt.u32.totalorder %s2187_s24, %s2940_s10 }
  0xbf   : > { %p2190_p3 = pnand %p2188_p1, %p2502_p8 }
  0xc1   : > { %p2191_p13 = pneg %p2190_p3 }
  0xc3   : > { %p2196_p2 = pnand %p2194_p0, %p2191_p13 }
  0xc5   : > { %2199 = shalt.err (!%p2196_p2)
}
  0xc6   : > { %s2200_s15 = scalar_lea.vmem %s447_s19, 512  ;;  %p2208_p10 = scmp.lt.s32.totalorder %s447_s19, %s447_s19 }
  0xc7   : > { %p2201_p5 = scmp.ne.s32.totalorder %s447_s19, %s2200_s15  ;;  %p2209_p11 = scmp.lt.s32.totalorder %s2200_s15, %s2200_s15 }
  0xc9   : > { %p2203_p7 = pnand %p2201_p5, %p2502_p8  ;;  %p2210_p12 = por %p2209_p11, %p2208_p10 }
  0xcb   : > { %p2204_p9 = pneg %p2203_p7 }
  0xcd   : > { %p2211_p4 = pnand %p2210_p12, %p2204_p9 }
  0xcf   : > { %2214 = shalt.err (!%p2211_p4)
}
  0xd0   : > { %1891 = dma.hbm_to_vmem [thread:$0]  (!%p2488_p6), %s2940_s10, 512, %s447_s19, [#allocation15], %s2364_s9, %s2364_s9, %s2365_s12  }
  0xd1   : > { %s2215_s13 = scalar_lea.hbm %s2941_s11, 512 }
  0xd2   : > { %p2216_p1 = scmp.ne.s32.totalorder %s2941_s11, %s2215_s13  ;;  %p2222_p0 = scmp.lt.u32.totalorder %s2215_s13, %s2941_s11 }
  0xd4   : > { %p2218_p3 = pnand %p2216_p1, %p2502_p8 }
  0xd6   : > { %p2219_p13 = pneg %p2218_p3 }
  0xd8   : > { %p2224_p2 = pnand %p2222_p0, %p2219_p13 }
  0xda   : > { %2227 = shalt.err (!%p2224_p2)
}
  0xdb   : > { %s2228_s30 = scalar_lea.vmem %s460_s4, 512  ;;  %p2236_p10 = scmp.lt.s32.totalorder %s460_s4, %s460_s4 }
  0xdc   : > { %p2229_p5 = scmp.ne.s32.totalorder %s460_s4, %s2228_s30  ;;  %p2237_p11 = scmp.lt.s32.totalorder %s2228_s30, %s2228_s30 }
  0xde   : > { %p2231_p7 = pnand %p2229_p5, %p2502_p8  ;;  %p2238_p12 = por %p2237_p11, %p2236_p10 }
  0xe0   : > { %p2232_p9 = pneg %p2231_p7 }
  0xe2   : > { %p2239_p4 = pnand %p2238_p12, %p2232_p9 }
  0xe4   : > { %2242 = shalt.err (!%p2239_p4)
}
  0xe5   : > { %1894 = dma.hbm_to_vmem [thread:$0]  (!%p2488_p6), %s2941_s11, 512, %s460_s4, [#allocation18], %s2364_s9, %s2364_s9, %s2365_s12  }
  0xe6   : > { %s1638_s20 = sadd.s32 4294967294, %s2359_s28   ;;  %s2696_s16 = sadd.s32 1, %s2359_s28  }
  0xe7   : > { %s41_s15 = sadd.s32 1, %s2355_s27  ;;  %s38_s2 = ssub.s32 %s2359_s28, %s2696_s16 }
  0xe8   : > { %p48_p8 = scmp.ne.s32.totalorder %s2355_s27, %s2351_s26  ;;  %p39_p1 = scmp.eq.s32.totalorder %s38_s2, 0 }
  0xe9   : > { %p49_p3 = scmp.eq.s32.totalorder %s2359_s28, 0  ;;  %p54_p13 = scmp.ne.s32.totalorder %s2351_s26, %s2347_s25 }
  0xea   : > { %p335_p0 = scmp.eq.s32.totalorder %s2470_s14, 1  ;;  %p2962_p5 = scmp.eq.s32.totalorder %s2470_s14, 0 }
  0xeb   : > { %s2708_s21 = scalar_select %p39_p1, %s2355_s27, %s41_s15  }
  0xec   : > { %p50_p2 = por %p49_p3, %p48_p8  ;;  %p2712_p7 = por %p2962_p5, %p54_p13 }
  0xed   : > { %p2716_p6 = por %p335_p0, %p48_p8  ;;  %p341_p9 = scmp.eq.s32.totalorder %s1638_s20, 1 }
  0xee   : > { %p1912_p10 = scmp.lt.s32.totalorder %s2359_s28, 2  ;;  %s476_s12 = sand.u32 1, %s2355_s27  }
  0xef   : > { %s2964_s9 = scalar_select %p2716_p6, 1, 0 }
  0xf0   : > { %p2722_p11 = por %p341_p9, %p54_p13  ;;  %s1650_s1 = sshll.u32 %s476_s12, 3 }
  0xf1   : > { %s1651_s13 = sshll.u32 %s2359_s28, 7  ;;  %s480_s22 = scalar_lea.vmem [#allocation2], %s1650_s1 }
  0xf2   : > { %s2965_s4 = scalar_select %p2722_p11, 1, 0 }
  0xf3   : > { %s2730_s18 = scalar_lea.hbm %s2930_s0, %s1651_s13  ;;  %s487_s30 = sshll.u32 %s480_s22, 4  ;;  %s2736_s30 = int_to_ptr.vmem [resolvable:$true] %s487_s30 }
  0xf4   : > { %p2732_p12 = pnand %p1912_p10, %p50_p2  ;;  %s477_s29 = scalar_lea.sflag [#allocation3], %s476_s12 }
  0xf5   : > { %s2243_s20 = scalar_lea.hbm %s2730_s18, 128  ;;  %s2248_s1 = scalar_lea.hbm %s2930_s0, 256 }
  0xf6   : > { %p2244_p4 = scmp.ne.s32.totalorder %s2730_s18, %s2243_s20  ;;  %p2245_p8 = pneg %p2732_p12 }
  0xf7   : > { %p2249_p13 = scmp.lt.u32.totalorder %s2730_s18, %s2930_s0  ;;  %p2250_p0 = scmp.lt.u32.totalorder %s2248_s1, %s2243_s20 }
  0xf8   : > { %p2246_p1 = pnand %p2245_p8, %p2244_p4  ;;  %p2252_p5 = scmp.lt.u32.totalorder %s2243_s20, %s2730_s18 }
  0xf9   : > { %p2251_p2 = por %p2250_p0, %p2249_p13 }
  0xfa   : > { %p2247_p3 = pneg %p2246_p1 }
  0xfb   : > { %p2253_p9 = por %p2252_p5, %p2251_p2 }
  0xfd   : > { %p2254_p10 = pnand %p2253_p9, %p2247_p3 }
  0xff   : > { %2257 = shalt.err (!%p2254_p10)
}
 0x100   : > { %s2258_s12 = scalar_lea.vmem %s2736_s30, 128  ;;  %s2372_s24 = smov [#allocation2]  }
 0x101   : > { %p2259_p4 = scmp.ne.s32.totalorder %s2736_s30, %s2258_s12  ;;  %s2263_s22 = sshll.u32 %s2372_s24, 4  ;;  %s2264_s22 = int_to_ptr.vmem [resolvable:$false] %s2263_s22 }
 0x102   : > { %s2265_s15 = scalar_lea.vmem %s2264_s22, 256  ;;  %p2266_p6 = scmp.lt.s32.totalorder %s2736_s30, %s2264_s22 }
 0x103   : > { %p2261_p1 = pnand %p2259_p4, %p2245_p8  ;;  %p2267_p13 = scmp.lt.s32.totalorder %s2265_s15, %s2258_s12 }
 0x105   : > { %p2262_p11 = pneg %p2261_p1  ;;  %p2268_p0 = por %p2267_p13, %p2266_p6 }
 0x107   : > { %p2269_p2 = pnand %p2268_p0, %p2262_p11 }
 0x109   : > { %2272 = shalt.err (!%p2269_p2)
}
 0x10a   : > { %1898 = dma.hbm_to_vmem [thread:$0]  (!%p2732_p12), %s2730_s18, 128, %s2736_s30, %s477_s29  }
 0x10b   : > { %s2967_s20 = sld [smem:[#allocation27_spill]] }
 0x111   : > { %p2968_p3 = scmp.ne.s32.totalorder %s2967_s20, 0 }
 0x112   : > { %s2766_s2 = sand.u32 (!%p2968_p3), 1, %s2351_s26  }
 0x113   : > { %502 = sbr.rel (%p2968_p3) target bundleno = 2279 (0x8e7), region = 72  ;;  %s1653_s1 = sshll.u32 (!%p2968_p3), %s2766_s2, 3 }
 0x114   : > { %s505_s13 = scalar_lea.sflag (!%p2968_p3), [#allocation3], %s2766_s2  ;;  %s508_s23 = scalar_lea.vmem (!%p2968_p3), [#allocation2], %s1653_s1 }
 0x11a   : > { %2318 = dma.done.wait (%p2712_p7), %s505_s13, 128  }
 0x11b   : > { %2320 = vsyncadd (%p2712_p7), %s505_s13, 4294967168  ;;  %p2969_p6 = scmp.eq.s32.totalorder %s2470_s14, 0 }
 0x11d   : > { %2322 = dma.done.wait (%p2969_p6), [#allocation6], 32   ;;  %p2970_p11 = pmov %p2969_p6 }
 0x11e   : > { %p2971_p12 = pmov %p2969_p6 }
 0x11f   : > { %2324 = vsyncadd (%p2970_p11), [#allocation6], 4294967264 }
 0x120   : > { %2326 = dma.done.wait (%p2971_p12), [#allocation9], 32   ;;  %p2972_p8 = pmov %p2969_p6 }
 0x121   : > { %p2973_p5 = pmov %p2969_p6 }
 0x122   : > { %2328 = vsyncadd (%p2972_p8), [#allocation9], 4294967264 }
 0x123   : > { %2330 = dma.done.wait (%p2973_p5), [#allocation12], 512   ;;  %p2974_p9 = pmov %p2973_p5 }
 0x124   : > { %p2975_p7 = pmov %p2973_p5 }
 0x125   : > { %2332 = vsyncadd (%p2974_p9), [#allocation12], 4294966784 }
 0x126   : > { %2334 = dma.done.wait (%p2975_p7), [#allocation15], 1024   ;;  %p2976_p10 = pmov %p2973_p5 }
 0x127   : > { %p2977_p4 = pmov %p2973_p5 }
 0x128   : > { %2336 = vsyncadd (%p2976_p10), [#allocation15], 4294966272 }
 0x129   : > { %2338 = dma.done.wait (%p2977_p4), [#allocation18], 512   ;;  %p2978_p1 = pmov %p2977_p4 }
 0x12a   : > { %p590_p13 = scmp.lt.s32.totalorder %s2470_s14, 1  ;;  %s2979_s19 = sld [smem:[#allocation28_spill]]  ;;  %vm597_vm0 = vcmask 122880   ;;  %vm778_vm1 = vcmask 261120   ;;  %v593_v1 = vld [vmem:[%s508_s23] sm:$0xff]  ;;  %v614_v14 = vld [vmem:[#allocation11] sm:$0xff]  ;;  %v807_v55 = vlaneseq }
 0x12b   : > { %2340 = vsyncadd (%p2978_p1), [#allocation18], 4294966784  ;;  %v779_v3 = vsel %vm778_vm1, %v593_v1, 0.0  ;;  %v615_v15 = vld [vmem:[#allocation11 + $0x8] sm:$0xff]  ;;  %v2373_v16 = vmov 0.0|0.0   ;;  %vm2374_vm2 = vmmov 0  }
 0x12c   : > { %s591_s17 = scalar_select %p590_p13, %s2470_s14, 1  ;;  %780 = vadd.xlane.f32.xlu1 %v779_v3  ;;  %1797 = vmatprep.subr.bf16.mxu1 %v2373_v16  ;;  %v1798_v17 = vpack.c.bf16 %v615_v15, %v614_v14  ;;  %v2375_v18 = vmov 0.0   ;;  %v595_v23 = vld [vmem:[#allocation8] sm:$0x1]  ;;  %v690_v25 = vld [vmem:[#allocation13] sm:$0xff]  ;;  %vm616_vm3 = vcmask 130048  }
 0x12d   : > { %1723 = vmatprep.mubr.msk.f32.mxu1 %vm2374_vm2, %v2375_v18  ;;  %1803 = vmatprep.subr.bf16.mxu0 %v2373_v16  ;;  %v691_v26 = vld [vmem:[#allocation13 + $0x8] sm:$0xff]  ;;  %v817_v31 = vld [vmem:[#allocation14] sm:$0xff]  ;;  %v818_v32 = vld [vmem:[#allocation14 + $0x8] sm:$0xff]  ;;  %s2980_s22 = sld [smem:[#allocation31_spill]]  ;;  %v808_v58 = vshrl.u32 %v807_v55, 7  ;;  %s2376_s30 = smov 112  }
 0x12e   : > { %1741 = vmatprep.mubr.msk.f32.mxu0 %vm2374_vm2, %v2375_v18  ;;  %1799 = vmatpush3.bf16.msra.mxu1 %v1798_v17  ;;  %v596_v27 = vld [vmem:[#allocation10] sm:$0x1]  ;;  %v1801_v29 = vpack.c.bf16 %v691_v26, %v690_v25  ;;  %v1804_v33 = vpack.c.bf16 %v818_v32, %v817_v31  ;;  %v819_v37 = vld [vmem:[#allocation14 + $0x10] sm:$0xff]  ;;  %v1668_v60 = vld [vmem:[#allocation5] ss:$0 sm:$0xff]  ;;  %vm1118_vm4 = vcmask 64512  }
 0x12f   : > { %1800 = vmatprep.subr.bf16.mxu1 %v2373_v16  ;;  %v820_v38 = vld [vmem:[#allocation14 + $0x18] sm:$0xff]  ;;  %v809_v61 = vsub.s32 0, %v808_v58  ;;  %s2981_s24 = sld [smem:[#allocation32_spill]]  ;;  %s1682_s15 = sshll.u32 %s2470_s14, 7 }
 0x130   : > { %s592_s29 = scalar_lea.vmem %s2979_s19, %s591_s17  ;;  %1805 = vmatpush3.bf16.msra.mxu0 %v1804_v33  ;;  %v1807_v39 = vpack.c.bf16 %v820_v38, %v819_v37  ;;  %v971_v14 = vld [vmem:[#allocation16 + $0x18] sm:$0xff]  ;;  %s2377_s19 = smov 16  }
 0x131   : > { %v594_v0 = vld [vmem:[%s592_s29] sm:$0x1]  ;;  %1806 = vmatprep.subr.bf16.mxu0 %v2373_v16  ;;  %s589_s20 = scalar_lea.vmem [#allocation19], %s1653_s1  ;;  %s2982_s18 = sld [smem:[#allocation33_spill]] }
 0x132   : > { %v598_v2 = vsel %vm597_vm0, %v594_v0, 0.0  ;;  %s1473_s13 = sshll.u32 %s589_s20, 4  ;;  %p2983_p2 = scmp.ne.s32.totalorder %s2964_s9, 0  ;;  %s2887_s13 = int_to_ptr.vmem [resolvable:$true] %s1473_s13 }
 0x133   : > { %599 = vadd.xlane.f32.xlu0 %v598_v2  ;;  %v894_v34 = vld [vmem:[%s2980_s22] sm:$0xff]  ;;  %v895_v35 = vld [vmem:[%s2980_s22 + $0x8] sm:$0xff]  ;;  %v896_v40 = vld [vmem:[%s2980_s22 + $0x10] sm:$0xff]  ;;  %s2273_s14 = scalar_lea.vmem %s2887_s13, 128  ;;  %s2378_s1 = smov [#allocation19]  }
 0x134   : > { %v1810_v36 = vpack.c.bf16 %v895_v35, %v894_v34  ;;  %v897_v41 = vld [vmem:[%s2980_s22 + $0x18] sm:$0xff]  ;;  %1808 = vmatpush3.bf16.msra.mxu0 %v1807_v39  ;;  %p2274_p0 = scmp.ne.s32.totalorder %s2887_s13, %s2273_s14  ;;  %s2277_s29 = sshll.u32 %s2378_s1, 4  ;;  %s2278_s29 = int_to_ptr.vmem [resolvable:$false] %s2277_s29 }
 0x135   : > { %v1813_v42 = vpack.c.bf16 %v897_v41, %v896_v40  ;;  %1815 = vmatprep.subr.bf16.mxu0 %v2373_v16  ;;  %s2279_s12 = scalar_lea.vmem %s2278_s29, 256  ;;  %p2280_p11 = scmp.lt.s32.totalorder %s2887_s13, %s2278_s29 }
 0x136   : > { %p2275_p3 = pnand %p2274_p0, %p2983_p2  ;;  %p2281_p12 = scmp.lt.s32.totalorder %s2279_s12, %s2273_s14 }
 0x138   : > { %p2276_p6 = pneg %p2275_p3  ;;  %p2282_p8 = por %p2281_p12, %p2280_p11 }
 0x13a   : > { %p2283_p5 = pnand %p2282_p8, %p2276_p6 }
 0x1b9   : > { %v781_v5 = vpop.xlane.xlu1 %780 }
 0x1ba   : > { %v783_v7 = vmul.f32 0.03125, %v781_v5 }
 0x1bc   : > { %v2803_v9 = vsub.f32 %v593_v1, %v783_v7  ;;  %v1669_v1 = vld [vmem:[#allocation7] ss:$0 sm:$0xff]  ;;  %v969_v7 = vld [vmem:[#allocation16 + $0x8] sm:$0xff] }
 0x1be   : > { %v785_v11 = vmul.f32 %v2803_v9, %v2803_v9 }
 0x1c0   : > { %v600_v4 = vpop.xlane.xlu0 %599  ;;  %v786_v13 = vsel %vm778_vm1, %v785_v11, 0.0 }
 0x1c1   : > { %v602_v6 = vmul.f32 0.0625, %v600_v4  ;;  %787 = vadd.xlane.f32.xlu1 %v786_v13  ;;  %v970_v13 = vld [vmem:[#allocation16 + $0x10] sm:$0xff] }
 0x1c3   : > { %v603_v8 = vsub.f32 %v594_v0, %v602_v6  ;;  %v968_v6 = vld [vmem:[#allocation16] sm:$0xff] }
 0x1c4   : > { %v1816_v11 = vpack.c.bf16 %v969_v7, %v968_v6 }
 0x1c5   : > { %v604_v10 = vmul.f32 %v603_v8, %v603_v8 }
 0x1c7   : > { %v605_v12 = vsel %vm597_vm0, %v604_v10, 0.0 }
 0x1c8   : > { %606 = vadd.xlane.f32.xlu0 %v605_v12 }
 0x24e   : > { %v788_v43 = vpop.xlane.xlu1 %787 }
 0x24f   : > { %v789_v47 = vmul.f32 0.03125, %v788_v43 }
 0x251   : > { %v790_v51 = vadd.f32 1e-05, %v789_v47 }
 0x255   : > { %v607_v19 = vpop.xlane.xlu0 %606 }
 0x256   : > { %v608_v20 = vmul.f32 0.0625, %v607_v19 }
 0x258   : > { %v609_v21 = vadd.f32 1e-05, %v608_v20 }
 0x25a   : > { %1971 = vrsqrt.f32 %v609_v21 }
 0x264   : > { %v1972_v22 = vpop.eup %1971 }
 0x265   : > { %v611_v24 = vmul.f32 %v1972_v22, %v603_v8 }
 0x267   : > { %v612_v28 = vmul.f32 %v611_v24, %v595_v23 }
 0x269   : > { %v613_v30 = vadd.f32 %v612_v28, %v596_v27 }
 0x26b   : > { %1724 = vmatmul.mubr.msk.f32.vlgmr.msra.gmra.mrb[0].mxu1 %vm616_vm3, %v613_v30 }
 0x26c   : > { %1802 = vmatpush3.bf16.msra.mxu1 %v1801_v29  ;;  %1730 = vmatprep.mubr.msk.f32.mxu1 %vm2374_vm2, %v2375_v18 }
 0x26d   : > { %1809 = vmatprep.subr.bf16.mxu1 %v2373_v16 }
 0x26f   : > { %1731 = vmatmul.mubr.msk.f32.vlgmr.msra.gmra.mrb[2].mxu1 %vm616_vm3, %v613_v30 }
 0x270   : > { %1752 = vmatprep.mubr.msk.f32.mxu1 %vm2374_vm2, %v2375_v18  ;;  %1811 = vmatpush3.bf16.msra.mxu1 %v1810_v36 }
 0x271   : > { %1812 = vmatprep.subr.bf16.mxu1 %v2373_v16 }
 0x274   : > { %1814 = vmatpush3.bf16.msra.mxu1 %v1813_v42 }
 0x275   : > { %1766 = vmatprep.subr.mxu1 %v2375_v18 }
 0x33e   : > { %v686_v44 = vpop.f32.mrb[0].mxu1 }
 0x33f   : > { %v1666_v45 = vmul.f32 -1.442695, %v686_v44  ;;  %v1725_v46 = vpop.f32.mrb[1].mxu1 }
 0x341   : > { %1973 = vpow2.f32 %v1666_v45 }
 0x342   : > { %v758_v48 = vpop.f32.mrb[2].mxu1 }
 0x343   : > { %v1667_v49 = vmul.f32 -1.442695, %v758_v48  ;;  %v1732_v50 = vpop.f32.mrb[3].mxu1 }
 0x344   : > { %v1376_v50 = vld [vmem:[#allocation17 + $0x10] sm:$0xff] }
 0x345   : > { %1975 = vpow2.f32 %v1667_v49  ;;  %v1375_v49 = vld [vmem:[#allocation17 + $0x8] sm:$0xff] }
 0x346   : > { %1977 = vrsqrt.f32 %v790_v51 }
 0x34b   : > { %v1974_v52 = vpop.eup %1973 }
 0x34c   : > { %v765_v53 = vadd.f32 1.0, %v1974_v52  ;;  %v1377_v52 = vld [vmem:[#allocation17 + $0x18] sm:$0xff] }
 0x34e   : > { %1979 = vrcp.f32 %v765_v53  ;;  %v1825_v53 = vpack.c.bf16 %v1377_v52, %v1376_v50 }
 0x34f   : > { %v1976_v54 = vpop.eup %1975 }
 0x350   : > { %v772_v56 = vadd.f32 1.0, %v1976_v54  ;;  %v1978_v57 = vpop.eup %1977 }
 0x351   : > { %v792_v59 = vmul.f32 %v1978_v57, %v2803_v9  ;;  %v1819_v9 = vpack.c.bf16 %v971_v14, %v970_v13 }
 0x352   : > { %1981 = vrcp.f32 %v772_v56 }
 0x353   : > { %v799_v0 = vmul.f32 %v1668_v60, %v792_v59  ;;  %v1679_v59 = vld [vmem:[%s2981_s24] ss:$0 sm:$0xff] }
 0x355   : > { %v806_v4 = vadd.f32 %v1669_v1, %v799_v0 }
 0x358   : > { %v1980_v62 = vpop.eup %1979 }
 0x359   : > { %v768_v63 = vmul.f32 %v1980_v62, %v686_v44 }
 0x35b   : > { %v810_v2 = vrot.slane %v768_v63, %v809_v61 }
 0x35c   : > { %v1982_v3 = vpop.eup %1981 }
 0x35d   : > { %v775_v5 = vmul.f32 %v1982_v3, %v758_v48  ;;  %v811_v8 = vmul.f32 %v810_v2, %v806_v4  ;;  %v1374_v48 = vld [vmem:[#allocation17] sm:$0xff] }
 0x35e   : > { %v1822_v51 = vpack.c.bf16 %v1375_v49, %v1374_v48 }
 0x35f   : > { %v815_v10 = vrot.slane %v775_v5, %v809_v61 }
 0x361   : > { %v816_v12 = vadd.f32 %v815_v10, %v811_v8 }
 0x363   : > { %1742 = vmatmul.mubr.msk.f32.vlgmr.msra.gmra.mrb[0].mxu0 %vm778_vm1, %v816_v12  ;;  %1753 = vmatmul.mubr.msk.f32.vlgmr.msra.gmra.mrb[4].mxu1 %vm778_vm1, %v816_v12 }
 0x364   : > { %1817 = vmatpush3.bf16.msra.mxu0 %v1816_v11  ;;  %1763 = vmatprep.mubr.msk.f32.mxu0 %vm2374_vm2, %v2375_v18 }
 0x365   : > { %1818 = vmatprep.subr.bf16.mxu0 %v2373_v16  ;;  %1768 = vmatprep.mubr.msk.f32.mxu1 %vm2374_vm2, %v2375_v18 }
 0x368   : > { %1820 = vmatpush3.bf16.msra.mxu0 %v1819_v9 }
 0x369   : > { %1776 = vmatprep.subr.mxu0 %v2375_v18 }
 0x36b   : > { %1764 = vmatmul.mubr.msk.f32.vlgmr.msra.gmra.mrb[2].mxu0 %vm778_vm1, %v816_v12 }
 0x36c   : > { %1778 = vmatprep.mubr.msk.f32.mxu0 %vm2374_vm2, %v2375_v18 }
 0x436   : > { %v890_v15 = vpop.f32.mrb[0].mxu0  ;;  %v964_v17 = vpop.f32.mrb[4].mxu1 }
 0x437   : > { %1205 = vrot.lane.b32.xlu0 %v964_v17, %s2376_s30  ;;  %v1754_v19 = vpop.f32.mrb[5].mxu1  ;;  %1767 = vmatpush3.xpose.msk.msra.mxu1 %vm616_vm3, %v964_v17  ;;  %v1743_v20 = vpop.f32.mrb[1].mxu0 }
 0x438   : > { %1203 = vrot.lane.b32.xlu1 %v890_v15, %s2376_s30  ;;  %1771 = vmatprep.subr.mxu1 %v2375_v18 }
 0x43a   : > { %1769 = vmatmul.mubr.msk.f32.vlgmr.msra.gmra.mrb[6].mxu1 %vm616_vm3, %v890_v15 }
 0x43b   : > { %1773 = vmatprep.mubr.msk.f32.mxu1 %vm2374_vm2, %v2375_v18 }
 0x43e   : > { %v1038_v21 = vpop.f32.mrb[2].mxu0 }
 0x43f   : > { %v1765_v22 = vpop.f32.mrb[3].mxu0  ;;  %1772 = vmatpush3.msra.mxu1 %v1038_v21 }
 0x440   : > { %1781 = vmatprep.subr.mxu1 %v2375_v18 }
 0x4a9   : > { %v1206_v23 = vpop.permute.xlu0 %1205 }
 0x4aa   : > { %1777 = vmatpush3.xpose.msk.msra.mxu0 %vm616_vm3, %v1206_v23  ;;  %v1204_v24 = vpop.permute.xlu1 %1203 }
 0x4ab   : > { %1821 = vmatprep.subr.bf16.mxu0 %v2373_v16 }
 0x4ad   : > { %1779 = vmatmul.mubr.msk.f32.vlgmr.msra.gmra.mrb[4].mxu0 %vm616_vm3, %v1204_v24 }
 0x4ae   : > { %1794 = vmatprep.mubr.msk.f32.mxu0 %vm2374_vm2, %v2375_v18  ;;  %1823 = vmatpush3.bf16.msra.mxu0 %v1822_v51 }
 0x4af   : > { %1824 = vmatprep.subr.bf16.mxu0 %v2373_v16 }
 0x4b2   : > { %1826 = vmatpush3.bf16.msra.mxu0 %v1825_v53 }
 0x50d   : > { %v1114_v25 = vpop.f32.mrb[6].mxu1 }
 0x50e   : > { %v1770_v26 = vpop.f32.mrb[7].mxu1  ;;  %v1119_v27 = vsel %vm1118_vm4, %v1114_v25, -inf }
 0x50f   : > { %1120 = vmax.xlane.f32.xlu1 %v1119_v27 }
 0x580   : > { %v1277_v28 = vpop.f32.mrb[4].mxu0 }
 0x581   : > { %v1780_v29 = vpop.f32.mrb[5].mxu0  ;;  %v1281_v30 = vsel %vm1118_vm4, %v1277_v28, -inf }
 0x582   : > { %1282 = vmax.xlane.f32.xlu0 %v1281_v30 }
 0x59c   : > { %v1121_v31 = vpop.xlane.xlu1 %1120 }
 0x59d   : > { %v1122_v32 = vsub.f32 %v1114_v25, %v1121_v31 }
 0x59f   : > { %v1123_v33 = vmul.f32 1.442695, %v1122_v32 }
 0x5a1   : > { %1983 = vpow2.f32 %v1123_v33 }
 0x5ab   : > { %v1984_v34 = vpop.eup %1983 }
 0x5ac   : > { %v1125_v35 = vsel %vm1118_vm4, %v1984_v34, 0.0 }
 0x5ad   : > { %1126 = vadd.xlane.f32.xlu0 %v1125_v35 }
 0x5c3   : > { %1293 = vrot.lane.b32.xlu0 %v1038_v21, %s2376_s30  ;;  %s2885_s30 = scalar_lea.hbm %s2982_s18, %s1682_s15 }
 0x60f   : > { %v1283_v36 = vpop.xlane.xlu0 %1282 }
 0x610   : > { %v1284_v37 = vsub.f32 %v1277_v28, %v1283_v36 }
 0x612   : > { %v1285_v38 = vmul.f32 1.442695, %v1284_v37 }
 0x614   : > { %1985 = vpow2.f32 %v1285_v38 }
 0x61e   : > { %v1986_v39 = vpop.eup %1985 }
 0x61f   : > { %v1287_v40 = vsel %vm1118_vm4, %v1986_v39, 0.0 }
 0x620   : > { %1288 = vadd.xlane.f32.xlu1 %v1287_v40 }
 0x63a   : > { %v1127_v41 = vpop.xlane.xlu0 %1126 }
 0x63b   : > { %1987 = vrcp.f32 %v1127_v41 }
 0x63e   : > { %v1294_v44 = vpop.permute.xlu0 %1293 }
 0x645   : > { %v1988_v42 = vpop.eup %1987 }
 0x646   : > { %v1129_v43 = vmul.f32 %v1988_v42, %v1984_v34 }
 0x648   : > { %1774 = vmatmul.mubr.msk.f32.vlgmr.msra.gmra.mrb[8].mxu1 %vm1118_vm4, %v1129_v43 }
 0x649   : > { %1782 = vmatpush3.msra.mxu1 %v1294_v44  ;;  %1783 = vmatprep.mubr.msk.f32.mxu1 %vm2374_vm2, %v2375_v18 }
 0x6ad   : > { %v1289_v45 = vpop.xlane.xlu1 %1288 }
 0x6ae   : > { %1989 = vrcp.f32 %v1289_v45 }
 0x6b8   : > { %v1990_v46 = vpop.eup %1989 }
 0x6b9   : > { %v1291_v47 = vmul.f32 %v1990_v46, %v1986_v39 }
 0x6bb   : > { %1784 = vmatmul.mubr.msk.f32.vlgmr.msra.gmra.mrb[10].mxu1 %vm1118_vm4, %v1291_v47 }
 0x71b   : > { %v1199_v54 = vpop.f32.mrb[8].mxu1 }
 0x71c   : > { %v1775_v18 = vpop.f32.mrb[9].mxu1 }
 0x78e   : > { %v1365_v55 = vpop.f32.mrb[10].mxu1 }
 0x78f   : > { %1370 = vrot.lane.b32.xlu1 %v1365_v55, %s2377_s19  ;;  %v1785_v56 = vpop.f32.mrb[11].mxu1  ;;  %s1460_s19 = scalar_lea.sflag [#allocation4], %s2766_s2 }
 0x801   : > { %v1371_v57 = vpop.permute.xlu1 %1370 }
 0x802   : > { %v1373_v58 = vsel %vm616_vm3, %v1199_v54, %v1371_v57 }
 0x803   : > { %1795 = vmatmul.mubr.msk.f32.vlgmr.msra.gmra.mrb[6].mxu0 %vm778_vm1, %v1373_v58 }
 0x8d6   : > { %v1454_v16 = vpop.f32.mrb[6].mxu0 }
 0x8d7   : > { %v1455_v60 = vadd.f32 %v1679_v59, %v1454_v16  ;;  %v1796_v61 = vpop.f32.mrb[7].mxu0 }
 0x8d9   : > { %1458 = vst.msk [vmem:[%s589_s20] sm:$0xff] %vm778_vm1, %v1455_v60 }
 0x8da   : > { %2286 = shalt.err (!%p2283_p5)
}
 0x8db   : > { %s2287_s2 = scalar_lea.hbm %s2885_s30, 128  ;;  %s2291_s20 = scalar_lea.hbm %s2982_s18, 256 }
 0x8dc   : > { %p2288_p9 = scmp.ne.s32.totalorder %s2885_s30, %s2287_s2  ;;  %p2292_p4 = scmp.lt.u32.totalorder %s2885_s30, %s2982_s18 }
 0x8dd   : > { %p2293_p1 = scmp.lt.u32.totalorder %s2291_s20, %s2287_s2  ;;  %p2295_p0 = scmp.lt.u32.totalorder %s2287_s2, %s2885_s30 }
 0x8de   : > { %p2289_p7 = pnand %p2288_p9, %p2983_p2 }
 0x8df   : > { %p2294_p13 = por %p2293_p1, %p2292_p4 }
 0x8e0   : > { %p2290_p10 = pneg %p2289_p7 }
 0x8e1   : > { %p2296_p3 = por %p2295_p0, %p2294_p13 }
 0x8e3   : > { %p2297_p6 = pnand %p2296_p3, %p2290_p10 }
 0x8e5   : > { %2300 = shalt.err (!%p2297_p6)
}
 0x8e6   : > { %1865 = dma.vmem_to_hbm [thread:$0]  (%p2983_p2), %s2887_s13, 128, %s2885_s30, %s1460_s19  }
 0x8e7 PF: > { %s1485_s14 = sand.u32 1, %s2347_s25   ;;  %p2984_p11 = scmp.ne.s32.totalorder %s2965_s4, 0 }
 0x8e8   : > { %p2985_p12 = scmp.ge.s32.totalorder %s2359_s28, 2  ;;  %s1486_s1 = scalar_lea.sflag [#allocation4], %s1485_s14 }
 0x8ea   : > { %p1900_p8 = pnand %p2985_p12, %p2984_p11 }
 0x8ec   : > { %2342 = dma.done.wait (!%p1900_p8), %s1486_s1, 128  }
 0x8ed   : > { %2344 = vsyncadd (!%p1900_p8), %s1486_s1, 4294967168  ;;  %p31_p5 = scmp.ge.s32.totalorder %s2696_s16, 4   ;;  %s2986_s25 = smov %s2351_s26 }
 0x8ee   : > { %s2987_s26 = smov %s2355_s27  ;;  %s2988_s27 = smov %s2708_s21 }
 0x8ef   : > { %s2989_s28 = smov %s2696_s16  ;;  %33 = sbr.rel (!%p31_p5) target bundleno = 17 (0x11), region = 156 }
 0x8f6   :  { %1491 = vsyncpa [#allocation3], 1 }
 0x8f7   :  { %1493 = vsyncpa [#allocation3 + $0x1], 1 }
 0x8f8   :  { %1494 = vsyncpa [#allocation6], 1 }
 0x8f9   :  { %1495 = vsyncpa [#allocation9], 1 }
 0x8fa   :  { %1496 = vsyncpa [#allocation12], 1 }
 0x8fb   :  { %1497 = vsyncpa [#allocation15], 1 }
 0x8fc   :  { %1498 = vsyncpa [#allocation18], 1 }
 0x8fd   :  { %1499 = vsyncpa [#allocation4], 1 }
 0x8fe   :  { %1501 = vsyncpa [#allocation4 + $0x1], 1 }

// kernel: tpu_custom_call.1
= control target key start
LH: loop header
LB: loop body
LE: loop exit
PB: predicated region body
PF: predicated region fallthrough
CT: control target
= control target key end

     0   :  { %s2930_s0 = inlined_call_operand.hbm [shape: f32[16,32], index: 0, kind: input, shape index: {}]   ;;  %s2931_s1 = inlined_call_operand.vmem [shape: f32[2,1,16], index: 1, kind: input, shape index: {}]   ;;  %s2932_s2 = inlined_call_operand.hbm [shape: f32[1,32], index: 2, kind: input, shape index: {}]   ;;  %s2933_s3 = inlined_call_operand.hbm [shape: f32[1,32], index: 3, kind: input, shape index: {}]   ;;  %s2934_s4 = inlined_call_operand.hbm [shape: f32[1,16], index: 4, kind: input, shape index: {}]   ;;  %s2935_s5 = inlined_call_operand.hbm [shape: f32[1,16], index: 5, kind: input, shape index: {}]   ;;  %s2936_s6 = inlined_call_operand.hbm [shape: f32[16,32], index: 6, kind: input, shape index: {}]   ;;  %s2937_s7 = inlined_call_operand.hbm [shape: f32[16,32], index: 7, kind: input, shape index: {}]   ;;  %s2938_s8 = inlined_call_operand.hbm [shape: f32[32,32], index: 8, kind: input, shape index: {}]   ;;  %s2939_s9 = inlined_call_operand.vmem [shape: f32[32,32], index: 9, kind: input, shape index: {}]   ;;  %s2940_s10 = inlined_call_operand.hbm [shape: f32[32,32], index: 10, kind: input, shape index: {}]   ;;  %s2941_s11 = inlined_call_operand.hbm [shape: f32[32,32], index: 11, kind: input, shape index: {}]   ;;  %s2942_s12 = inlined_call_operand.vmem [shape: f32[1,32], index: 12, kind: input, shape index: {}]   ;;  %s2943_s13 = inlined_call_operand.hbm [shape: f32[16,32], index: 13, kind: output, shape index: {}]  }
   0x1   :  { %2950 = sst [smem:[#allocation28_spill]] %s2931_s1 }
   0x2   :  { %2951 = sst [smem:[#allocation29_spill]] %s2932_s2 }
   0x3   :  { %2952 = sst [smem:[#allocation30_spill]] %s2934_s4 }
   0x4   :  { %2953 = sst [smem:[#allocation31_spill]] %s2939_s9 }
   0x5   :  { %2954 = sst [smem:[#allocation32_spill]] %s2942_s12 }
   0x6   :  { %2955 = sst [smem:[#allocation33_spill]] %s2943_s13 }
   0x7   :  { %18 = vsyncpa [#allocation3], 0 }
   0x8   :  { %20 = vsyncpa [#allocation3 + $0x1], 0 }
   0x9   :  { %21 = vsyncpa [#allocation6], 0 }
   0xa   :  { %22 = vsyncpa [#allocation9], 0 }
   0xb   :  { %23 = vsyncpa [#allocation12], 0 }
   0xc   :  { %24 = vsyncpa [#allocation15], 0 }
   0xd   :  { %25 = vsyncpa [#allocation18], 0 }
   0xe   :  { %26 = vsyncpa [#allocation4], 0 }
   0xf   :  { %28 = vsyncpa [#allocation4 + $0x1], 0  ;;  %s2449_s25 = smov 0   ;;  %s2451_s26 = smov 0  }
  0x10   :  { %s2453_s27 = smov 0   ;;  %s2455_s28 = smov 0  }
  0x11 LB: > { %s2361_s29 = smov [#allocation5]   ;;  %s2470_s14 = sadd.s32 4294967295, %s2359_s28   ;;  %s2359_s28 = sphi %s2455_s28, %s2989_s28   ;;  %s2355_s27 = sphi %s2453_s27, %s2988_s27   ;;  %s2351_s26 = sphi %s2451_s26, %s2987_s26   ;;  %s2347_s25 = sphi %s2449_s25, %s2986_s25  }
  0x12   : > { %s361_s30 = sshll.u32 %s2361_s29, 4  ;;  %p1639_p0 = scmp.ge.s32.totalorder %s2359_s28, 1  ;;  %s2475_s30 = int_to_ptr.vmem [resolvable:$true] %s361_s30 }
  0x13   : > { %p2947_p1 = scmp.eq.s32.totalorder %s2470_s14, 0  ;;  %p348_p2 = scmp.lt.s32.totalorder %s2359_s28, 3 }
  0x14   : > { %s2362_s16 = smov [#allocation8]   ;;  %s2363_s18 = smov [#allocation11]  }
  0x15   : > { %p2477_p3 = pnand %p1639_p0, %p348_p2  ;;  %s383_s17 = sshll.u32 %s2362_s16, 4  ;;  %s2484_s17 = int_to_ptr.vmem [resolvable:$true] %s383_s17 }
  0x16   : > { %s404_s19 = sshll.u32 %s2363_s18, 4  ;;  %s2959_s2 = sld [smem:[#allocation29_spill]]  ;;  %s2492_s19 = int_to_ptr.vmem [resolvable:$true] %s404_s19 }
  0x17   : > { %s2956_s15 = scalar_select %p2477_p3, 1, 0 }
  0x18   : > { %p1867_p5 = pneg %p2477_p3 }
  0x19   : > { %2957 = sst [smem:[#allocation27_spill]] %s2956_s15 }
  0x1a   : > { %p2488_p6 = pnand %p1867_p5, %p2947_p1 }
  0x1c   : > { %s1991_s23 = scalar_lea.hbm %s2959_s2, 16  ;;  %p2502_p8 = pneg %p2488_p6 }
  0x1d   : > { %p1992_p7 = scmp.ne.s32.totalorder %s2959_s2, %s1991_s23  ;;  %p1998_p11 = scmp.lt.u32.totalorder %s1991_s23, %s2959_s2 }
  0x1f   : > { %p1994_p9 = pnand %p2502_p8, %p1992_p7 }
  0x21   : > { %p1995_p10 = pneg %p1994_p9 }
  0x23   : > { %p2000_p12 = pnand %p1998_p11, %p1995_p10 }
  0x25   : > { %2003 = shalt.err (!%p2000_p12)
}
  0x26   : > { %s2004_s21 = scalar_lea.vmem %s2475_s30, 16  ;;  %s2011_s22 = scalar_lea.vmem %s2475_s30, 32 }
  0x27   : > { %p2005_p13 = scmp.ne.s32.totalorder %s2475_s30, %s2004_s21  ;;  %p2012_p5 = scmp.lt.s32.totalorder %s2475_s30, %s2475_s30 }
  0x28   : > { %p2013_p7 = scmp.lt.s32.totalorder %s2011_s22, %s2004_s21 }
  0x29   : > { %p2007_p0 = pnand %p2005_p13, %p2502_p8 }
  0x2a   : > { %p2014_p9 = por %p2013_p7, %p2012_p5 }
  0x2b   : > { %p2008_p2 = pneg %p2007_p0 }
  0x2d   : > { %p2015_p4 = pnand %p2014_p9, %p2008_p2 }
  0x2f   : > { %2018 = shalt.err (!%p2015_p4)
}
  0x30   : > { %1870 = dma.hbm_to_vmem [thread:$0]  (!%p2488_p6), %s2959_s2, 16, %s2475_s30, [#allocation6]  }
  0x31   : > { %s2961_s4 = sld [smem:[#allocation30_spill]] }
  0x37   : > { %s2019_s18 = scalar_lea.hbm %s2961_s4, 16 }
  0x38   : > { %p2020_p10 = scmp.ne.s32.totalorder %s2961_s4, %s2019_s18  ;;  %p2026_p4 = scmp.lt.u32.totalorder %s2019_s18, %s2961_s4 }
  0x3a   : > { %p2022_p11 = pnand %p2020_p10, %p2502_p8 }
  0x3c   : > { %p2023_p12 = pneg %p2022_p11 }
  0x3e   : > { %p2028_p13 = pnand %p2026_p4, %p2023_p12 }
  0x40   : > { %2031 = shalt.err (!%p2028_p13)
}
  0x41   : > { %s2032_s30 = scalar_lea.vmem %s2484_s17, 16  ;;  %s2039_s9 = scalar_lea.vmem %s2484_s17, 32 }
  0x42   : > { %p2033_p0 = scmp.ne.s32.totalorder %s2484_s17, %s2032_s30  ;;  %p2040_p7 = scmp.lt.s32.totalorder %s2484_s17, %s2484_s17 }
  0x43   : > { %p2041_p9 = scmp.lt.s32.totalorder %s2039_s9, %s2032_s30 }
  0x44   : > { %p2035_p2 = pnand %p2033_p0, %p2502_p8 }
  0x45   : > { %p2042_p10 = por %p2041_p9, %p2040_p7 }
  0x46   : > { %p2036_p5 = pneg %p2035_p2 }
  0x48   : > { %p2043_p11 = pnand %p2042_p10, %p2036_p5 }
  0x4a   : > { %2046 = shalt.err (!%p2043_p11)
}
  0x4b   : > { %1876 = dma.hbm_to_vmem [thread:$0]  (!%p2488_p6), %s2961_s4, 16, %s2484_s17, [#allocation9]  }
  0x4c   : > { %s2047_s29 = scalar_lea.hbm %s2936_s6, 256 }
  0x4d   : > { %p2048_p12 = scmp.ne.s32.totalorder %s2936_s6, %s2047_s29  ;;  %p2054_p0 = scmp.lt.u32.totalorder %s2047_s29, %s2936_s6 }
  0x4f   : > { %p2050_p4 = pnand %p2048_p12, %p2502_p8 }
  0x51   : > { %p2051_p13 = pneg %p2050_p4 }
  0x53   : > { %p2056_p2 = pnand %p2054_p0, %p2051_p13 }
  0x55   : > { %2059 = shalt.err (!%p2056_p2)
}
  0x56   : > { %s2060_s17 = scalar_lea.vmem %s2492_s19, 256  ;;  %p2068_p10 = scmp.lt.s32.totalorder %s2492_s19, %s2492_s19 }
  0x57   : > { %p2061_p5 = scmp.ne.s32.totalorder %s2492_s19, %s2060_s17  ;;  %p2069_p11 = scmp.lt.s32.totalorder %s2060_s17, %s2060_s17 }
  0x59   : > { %p2063_p7 = pnand %p2061_p5, %p2502_p8  ;;  %p2070_p12 = por %p2069_p11, %p2068_p10 }
  0x5b   : > { %p2064_p9 = pneg %p2063_p7 }
  0x5d   : > { %p2071_p4 = pnand %p2070_p12, %p2064_p9 }
  0x5f   : > { %2074 = shalt.err (!%p2071_p4)
}
  0x60   : > { %s2364_s9 = smov 128   ;;  %s2365_s12 = smov 8  }
  0x61   : > { %1882 = dma.hbm_to_vmem [thread:$0]  (!%p2488_p6), %s2936_s6, 256, %s2492_s19, [#allocation12], %s2364_s9, %s2364_s9, %s2365_s12  }
  0x62   : > { %s2366_s24 = smov [#allocation14]   ;;  %s2367_s18 = smov [#allocation7]  }
  0x63   : > { %s430_s29 = sshll.u32 %s2366_s24, 4  ;;  %s372_s21 = sshll.u32 %s2367_s18, 4  ;;  %s431_s29 = int_to_ptr.vmem [resolvable:$true] %s430_s29  ;;  %s373_s21 = int_to_ptr.vmem [resolvable:$true] %s372_s21 }
  0x64   : > { %s2075_s17 = scalar_lea.hbm %s2938_s8, 512 }
  0x65   : > { %p2076_p13 = scmp.ne.s32.totalorder %s2938_s8, %s2075_s17  ;;  %p2082_p5 = scmp.lt.u32.totalorder %s2075_s17, %s2938_s8 }
  0x67   : > { %p2078_p0 = pnand %p2076_p13, %p2502_p8 }
  0x69   : > { %p2079_p2 = pneg %p2078_p0 }
  0x6b   : > { %p2084_p7 = pnand %p2082_p5, %p2079_p2 }
  0x6d   : > { %2087 = shalt.err (!%p2084_p7)
}
  0x6e   : > { %s2088_s19 = scalar_lea.vmem %s431_s29, 512  ;;  %p2096_p12 = scmp.lt.s32.totalorder %s431_s29, %s431_s29 }
  0x6f   : > { %p2089_p9 = scmp.ne.s32.totalorder %s431_s29, %s2088_s19  ;;  %p2097_p4 = scmp.lt.s32.totalorder %s2088_s19, %s2088_s19 }
  0x71   : > { %p2091_p10 = pnand %p2089_p9, %p2502_p8  ;;  %p2098_p1 = por %p2097_p4, %p2096_p12 }
  0x73   : > { %p2092_p11 = pneg %p2091_p10 }
  0x75   : > { %p2099_p3 = pnand %p2098_p1, %p2092_p11 }
  0x77   : > { %2102 = shalt.err (!%p2099_p3)
}
  0x78   : > { %1888 = dma.hbm_to_vmem [thread:$0]  (!%p2488_p6), %s2938_s8, 512, %s431_s29, [#allocation15], %s2364_s9, %s2364_s9, %s2365_s12  }
  0x79   : > { %s2103_s13 = scalar_lea.hbm %s2933_s3, 16 }
  0x7a   : > { %p2104_p1 = scmp.ne.s32.totalorder %s2933_s3, %s2103_s13  ;;  %p2110_p0 = scmp.lt.u32.totalorder %s2103_s13, %s2933_s3 }
  0x7c   : > { %p2106_p3 = pnand %p2104_p1, %p2502_p8 }
  0x7e   : > { %p2107_p13 = pneg %p2106_p3 }
  0x80   : > { %p2112_p2 = pnand %p2110_p0, %p2107_p13 }
  0x82   : > { %2115 = shalt.err (!%p2112_p2)
}
  0x83   : > { %s2116_s30 = scalar_lea.vmem %s373_s21, 16  ;;  %s2123_s29 = scalar_lea.vmem %s373_s21, 32 }
  0x84   : > { %p2117_p5 = scmp.ne.s32.totalorder %s373_s21, %s2116_s30  ;;  %p2124_p10 = scmp.lt.s32.totalorder %s373_s21, %s373_s21 }
  0x85   : > { %p2125_p11 = scmp.lt.s32.totalorder %s2123_s29, %s2116_s30 }
  0x86   : > { %p2119_p7 = pnand %p2117_p5, %p2502_p8 }
  0x87   : > { %p2126_p12 = por %p2125_p11, %p2124_p10 }
  0x88   : > { %p2120_p9 = pneg %p2119_p7 }
  0x8a   : > { %p2127_p4 = pnand %p2126_p12, %p2120_p9 }
  0x8c   : > { %2130 = shalt.err (!%p2127_p4)
}
  0x8d   : > { %1873 = dma.hbm_to_vmem [thread:$0]  (!%p2488_p6), %s2933_s3, 16, %s373_s21, [#allocation6]  }
  0x8e   : > { %s2368_s1 = smov [#allocation10]   ;;  %s2369_s4 = smov [#allocation13]  }
  0x8f   : > { %s394_s2 = sshll.u32 %s2368_s1, 4  ;;  %s417_s15 = sshll.u32 %s2369_s4, 4  ;;  %s395_s2 = int_to_ptr.vmem [resolvable:$true] %s394_s2  ;;  %s418_s15 = int_to_ptr.vmem [resolvable:$true] %s417_s15 }
  0x90   : > { %s2131_s24 = scalar_lea.hbm %s2935_s5, 16 }
  0x91   : > { %p2132_p1 = scmp.ne.s32.totalorder %s2935_s5, %s2131_s24  ;;  %p2138_p0 = scmp.lt.u32.totalorder %s2131_s24, %s2935_s5 }
  0x93   : > { %p2134_p3 = pnand %p2132_p1, %p2502_p8 }
  0x95   : > { %p2135_p13 = pneg %p2134_p3 }
  0x97   : > { %p2140_p2 = pnand %p2138_p0, %p2135_p13 }
  0x99   : > { %2143 = shalt.err (!%p2140_p2)
}
  0x9a   : > { %s2144_s21 = scalar_lea.vmem %s395_s2, 16  ;;  %s2151_s17 = scalar_lea.vmem %s395_s2, 32 }
  0x9b   : > { %p2145_p5 = scmp.ne.s32.totalorder %s395_s2, %s2144_s21  ;;  %p2152_p10 = scmp.lt.s32.totalorder %s395_s2, %s395_s2 }
  0x9c   : > { %p2153_p11 = scmp.lt.s32.totalorder %s2151_s17, %s2144_s21 }
  0x9d   : > { %p2147_p7 = pnand %p2145_p5, %p2502_p8 }
  0x9e   : > { %p2154_p12 = por %p2153_p11, %p2152_p10 }
  0x9f   : > { %p2148_p9 = pneg %p2147_p7 }
  0xa1   : > { %p2155_p4 = pnand %p2154_p12, %p2148_p9 }
  0xa3   : > { %2158 = shalt.err (!%p2155_p4)
}
  0xa4   : > { %1879 = dma.hbm_to_vmem [thread:$0]  (!%p2488_p6), %s2935_s5, 16, %s395_s2, [#allocation9]  }
  0xa5   : > { %s2159_s23 = scalar_lea.hbm %s2937_s7, 256 }
  0xa6   : > { %p2160_p1 = scmp.ne.s32.totalorder %s2937_s7, %s2159_s23  ;;  %p2166_p0 = scmp.lt.u32.totalorder %s2159_s23, %s2937_s7 }
  0xa8   : > { %p2162_p3 = pnand %p2160_p1, %p2502_p8 }
  0xaa   : > { %p2163_p13 = pneg %p2162_p3 }
  0xac   : > { %p2168_p2 = pnand %p2166_p0, %p2163_p13 }
  0xae   : > { %2171 = shalt.err (!%p2168_p2)
}
  0xaf   : > { %s2172_s29 = scalar_lea.vmem %s418_s15, 256  ;;  %p2180_p10 = scmp.lt.s32.totalorder %s418_s15, %s418_s15 }
  0xb0   : > { %p2173_p5 = scmp.ne.s32.totalorder %s418_s15, %s2172_s29  ;;  %p2181_p11 = scmp.lt.s32.totalorder %s2172_s29, %s2172_s29 }
  0xb2   : > { %p2175_p7 = pnand %p2173_p5, %p2502_p8  ;;  %p2182_p12 = por %p2181_p11, %p2180_p10 }
  0xb4   : > { %p2176_p9 = pneg %p2175_p7 }
  0xb6   : > { %p2183_p4 = pnand %p2182_p12, %p2176_p9 }
  0xb8   : > { %2186 = shalt.err (!%p2183_p4)
}
  0xb9   : > { %1885 = dma.hbm_to_vmem [thread:$0]  (!%p2488_p6), %s2937_s7, 256, %s418_s15, [#allocation12], %s2364_s9, %s2364_s9, %s2365_s12  }
  0xba   : > { %s2370_s17 = smov [#allocation16]   ;;  %s2371_s1 = smov [#allocation17]  }
  0xbb   : > { %s446_s19 = sshll.u32 %s2370_s17, 4  ;;  %s459_s4 = sshll.u32 %s2371_s1, 4  ;;  %s447_s19 = int_to_ptr.vmem [resolvable:$true] %s446_s19  ;;  %s460_s4 = int_to_ptr.vmem [resolvable:$true] %s459_s4 }
  0xbc   : > { %s2187_s24 = scalar_lea.hbm %s2940_s10, 512 }
  0xbd   : > { %p2188_p1 = scmp.ne.s32.totalorder %s2940_s10, %s2187_s24  ;;  %p2194_p0 = scmp.lt.u32.totalorder %s2187_s24, %s2940_s10 }
  0xbf   : > { %p2190_p3 = pnand %p2188_p1, %p2502_p8 }
  0xc1   : > { %p2191_p13 = pneg %p2190_p3 }
  0xc3   : > { %p2196_p2 = pnand %p2194_p0, %p2191_p13 }
  0xc5   : > { %2199 = shalt.err (!%p2196_p2)
}
  0xc6   : > { %s2200_s15 = scalar_lea.vmem %s447_s19, 512  ;;  %p2208_p10 = scmp.lt.s32.totalorder %s447_s19, %s447_s19 }
  0xc7   : > { %p2201_p5 = scmp.ne.s32.totalorder %s447_s19, %s2200_s15  ;;  %p2209_p11 = scmp.lt.s32.totalorder %s2200_s15, %s2200_s15 }
  0xc9   : > { %p2203_p7 = pnand %p2201_p5, %p2502_p8  ;;  %p2210_p12 = por %p2209_p11, %p2208_p10 }
  0xcb   : > { %p2204_p9 = pneg %p2203_p7 }
  0xcd   : > { %p2211_p4 = pnand %p2210_p12, %p2204_p9 }
  0xcf   : > { %2214 = shalt.err (!%p2211_p4)
}
  0xd0   : > { %1891 = dma.hbm_to_vmem [thread:$0]  (!%p2488_p6), %s2940_s10, 512, %s447_s19, [#allocation15], %s2364_s9, %s2364_s9, %s2365_s12  }
  0xd1   : > { %s2215_s13 = scalar_lea.hbm %s2941_s11, 512 }
  0xd2   : > { %p2216_p1 = scmp.ne.s32.totalorder %s2941_s11, %s2215_s13  ;;  %p2222_p0 = scmp.lt.u32.totalorder %s2215_s13, %s2941_s11 }
  0xd4   : > { %p2218_p3 = pnand %p2216_p1, %p2502_p8 }
  0xd6   : > { %p2219_p13 = pneg %p2218_p3 }
  0xd8   : > { %p2224_p2 = pnand %p2222_p0, %p2219_p13 }
  0xda   : > { %2227 = shalt.err (!%p2224_p2)
}
  0xdb   : > { %s2228_s30 = scalar_lea.vmem %s460_s4, 512  ;;  %p2236_p10 = scmp.lt.s32.totalorder %s460_s4, %s460_s4 }
  0xdc   : > { %p2229_p5 = scmp.ne.s32.totalorder %s460_s4, %s2228_s30  ;;  %p2237_p11 = scmp.lt.s32.totalorder %s2228_s30, %s2228_s30 }
  0xde   : > { %p2231_p7 = pnand %p2229_p5, %p2502_p8  ;;  %p2238_p12 = por %p2237_p11, %p2236_p10 }
  0xe0   : > { %p2232_p9 = pneg %p2231_p7 }
  0xe2   : > { %p2239_p4 = pnand %p2238_p12, %p2232_p9 }
  0xe4   : > { %2242 = shalt.err (!%p2239_p4)
}
  0xe5   : > { %1894 = dma.hbm_to_vmem [thread:$0]  (!%p2488_p6), %s2941_s11, 512, %s460_s4, [#allocation18], %s2364_s9, %s2364_s9, %s2365_s12  }
  0xe6   : > { %s1638_s20 = sadd.s32 4294967294, %s2359_s28   ;;  %s2696_s16 = sadd.s32 1, %s2359_s28  }
  0xe7   : > { %s41_s15 = sadd.s32 1, %s2355_s27  ;;  %s38_s2 = ssub.s32 %s2359_s28, %s2696_s16 }
  0xe8   : > { %p48_p8 = scmp.ne.s32.totalorder %s2355_s27, %s2351_s26  ;;  %p39_p1 = scmp.eq.s32.totalorder %s38_s2, 0 }
  0xe9   : > { %p49_p3 = scmp.eq.s32.totalorder %s2359_s28, 0  ;;  %p54_p13 = scmp.ne.s32.totalorder %s2351_s26, %s2347_s25 }
  0xea   : > { %p335_p0 = scmp.eq.s32.totalorder %s2470_s14, 1  ;;  %p2962_p5 = scmp.eq.s32.totalorder %s2470_s14, 0 }
  0xeb   : > { %s2708_s21 = scalar_select %p39_p1, %s2355_s27, %s41_s15  }
  0xec   : > { %p50_p2 = por %p49_p3, %p48_p8  ;;  %p2712_p7 = por %p2962_p5, %p54_p13 }
  0xed   : > { %p2716_p6 = por %p335_p0, %p48_p8  ;;  %p341_p9 = scmp.eq.s32.totalorder %s1638_s20, 1 }
  0xee   : > { %p1912_p10 = scmp.lt.s32.totalorder %s2359_s28, 2  ;;  %s476_s12 = sand.u32 1, %s2355_s27  }
  0xef   : > { %s2964_s9 = scalar_select %p2716_p6, 1, 0 }
  0xf0   : > { %p2722_p11 = por %p341_p9, %p54_p13  ;;  %s1650_s1 = sshll.u32 %s476_s12, 3 }
  0xf1   : > { %s1651_s13 = sshll.u32 %s2359_s28, 7  ;;  %s480_s22 = scalar_lea.vmem [#allocation2], %s1650_s1 }
  0xf2   : > { %s2965_s4 = scalar_select %p2722_p11, 1, 0 }
  0xf3   : > { %s2730_s18 = scalar_lea.hbm %s2930_s0, %s1651_s13  ;;  %s487_s30 = sshll.u32 %s480_s22, 4  ;;  %s2736_s30 = int_to_ptr.vmem [resolvable:$true] %s487_s30 }
  0xf4   : > { %p2732_p12 = pnand %p1912_p10, %p50_p2  ;;  %s477_s29 = scalar_lea.sflag [#allocation3], %s476_s12 }
  0xf5   : > { %s2243_s20 = scalar_lea.hbm %s2730_s18, 128  ;;  %s2248_s1 = scalar_lea.hbm %s2930_s0, 256 }
  0xf6   : > { %p2244_p4 = scmp.ne.s32.totalorder %s2730_s18, %s2243_s20  ;;  %p2245_p8 = pneg %p2732_p12 }
  0xf7   : > { %p2249_p13 = scmp.lt.u32.totalorder %s2730_s18, %s2930_s0  ;;  %p2250_p0 = scmp.lt.u32.totalorder %s2248_s1, %s2243_s20 }
  0xf8   : > { %p2246_p1 = pnand %p2245_p8, %p2244_p4  ;;  %p2252_p5 = scmp.lt.u32.totalorder %s2243_s20, %s2730_s18 }
  0xf9   : > { %p2251_p2 = por %p2250_p0, %p2249_p13 }
  0xfa   : > { %p2247_p3 = pneg %p2246_p1 }
  0xfb   : > { %p2253_p9 = por %p2252_p5, %p2251_p2 }
  0xfd   : > { %p2254_p10 = pnand %p2253_p9, %p2247_p3 }
  0xff   : > { %2257 = shalt.err (!%p2254_p10)
}
 0x100   : > { %s2258_s12 = scalar_lea.vmem %s2736_s30, 128  ;;  %s2372_s24 = smov [#allocation2]  }
 0x101   : > { %p2259_p4 = scmp.ne.s32.totalorder %s2736_s30, %s2258_s12  ;;  %s2263_s22 = sshll.u32 %s2372_s24, 4  ;;  %s2264_s22 = int_to_ptr.vmem [resolvable:$false] %s2263_s22 }
 0x102   : > { %s2265_s15 = scalar_lea.vmem %s2264_s22, 256  ;;  %p2266_p6 = scmp.lt.s32.totalorder %s2736_s30, %s2264_s22 }
 0x103   : > { %p2261_p1 = pnand %p2259_p4, %p2245_p8  ;;  %p2267_p13 = scmp.lt.s32.totalorder %s2265_s15, %s2258_s12 }
 0x105   : > { %p2262_p11 = pneg %p2261_p1  ;;  %p2268_p0 = por %p2267_p13, %p2266_p6 }
 0x107   : > { %p2269_p2 = pnand %p2268_p0, %p2262_p11 }
 0x109   : > { %2272 = shalt.err (!%p2269_p2)
}
 0x10a   : > { %1898 = dma.hbm_to_vmem [thread:$0]  (!%p2732_p12), %s2730_s18, 128, %s2736_s30, %s477_s29  }
 0x10b   : > { %s2967_s20 = sld [smem:[#allocation27_spill]] }
 0x111   : > { %p2968_p3 = scmp.ne.s32.totalorder %s2967_s20, 0 }
 0x112   : > { %s2766_s2 = sand.u32 (!%p2968_p3), 1, %s2351_s26  }
 0x113   : > { %502 = sbr.rel (%p2968_p3) target bundleno = 2279 (0x8e7), region = 72  ;;  %s1653_s1 = sshll.u32 (!%p2968_p3), %s2766_s2, 3 }
 0x114   : > { %s505_s13 = scalar_lea.sflag (!%p2968_p3), [#allocation3], %s2766_s2  ;;  %s508_s23 = scalar_lea.vmem (!%p2968_p3), [#allocation2], %s1653_s1 }
 0x11a   : > { %2318 = dma.done.wait (%p2712_p7), %s505_s13, 128  }
 0x11b   : > { %2320 = vsyncadd (%p2712_p7), %s505_s13, 4294967168  ;;  %p2969_p6 = scmp.eq.s32.totalorder %s2470_s14, 0 }
 0x11d   : > { %2322 = dma.done.wait (%p2969_p6), [#allocation6], 32   ;;  %p2970_p11 = pmov %p2969_p6 }
 0x11e   : > { %p2971_p12 = pmov %p2969_p6 }
 0x11f   : > { %2324 = vsyncadd (%p2970_p11), [#allocation6], 4294967264 }
 0x120   : > { %2326 = dma.done.wait (%p2971_p12), [#allocation9], 32   ;;  %p2972_p8 = pmov %p2969_p6 }
 0x121   : > { %p2973_p5 = pmov %p2969_p6 }
 0x122   : > { %2328 = vsyncadd (%p2972_p8), [#allocation9], 4294967264 }
 0x123   : > { %2330 = dma.done.wait (%p2973_p5), [#allocation12], 512   ;;  %p2974_p9 = pmov %p2973_p5 }
 0x124   : > { %p2975_p7 = pmov %p2973_p5 }
 0x125   : > { %2332 = vsyncadd (%p2974_p9), [#allocation12], 4294966784 }
 0x126   : > { %2334 = dma.done.wait (%p2975_p7), [#allocation15], 1024   ;;  %p2976_p10 = pmov %p2973_p5 }
 0x127   : > { %p2977_p4 = pmov %p2973_p5 }
 0x128   : > { %2336 = vsyncadd (%p2976_p10), [#allocation15], 4294966272 }
 0x129   : > { %2338 = dma.done.wait (%p2977_p4), [#allocation18], 512   ;;  %p2978_p1 = pmov %p2977_p4 }
 0x12a   : > { %p590_p13 = scmp.lt.s32.totalorder %s2470_s14, 1  ;;  %s2979_s19 = sld [smem:[#allocation28_spill]]  ;;  %vm597_vm0 = vcmask 122880   ;;  %vm778_vm1 = vcmask 261120   ;;  %v593_v1 = vld [vmem:[%s508_s23] sm:$0xff]  ;;  %v614_v14 = vld [vmem:[#allocation11] sm:$0xff]  ;;  %v807_v55 = vlaneseq }
 0x12b   : > { %2340 = vsyncadd (%p2978_p1), [#allocation18], 4294966784  ;;  %v779_v3 = vsel %vm778_vm1, %v593_v1, 0.0  ;;  %v615_v15 = vld [vmem:[#allocation11 + $0x8] sm:$0xff]  ;;  %v2373_v16 = vmov 0.0|0.0   ;;  %vm2374_vm2 = vmmov 0  }
 0x12c   : > { %s591_s17 = scalar_select %p590_p13, %s2470_s14, 1  ;;  %780 = vadd.xlane.f32.xlu1 %v779_v3  ;;  %1797 = vmatprep.subr.bf16.mxu1 %v2373_v16  ;;  %v1798_v17 = vpack.c.bf16 %v615_v15, %v614_v14  ;;  %v2375_v18 = vmov 0.0   ;;  %v595_v23 = vld [vmem:[#allocation8] sm:$0x1]  ;;  %v690_v25 = vld [vmem:[#allocation13] sm:$0xff]  ;;  %vm616_vm3 = vcmask 130048  }
 0x12d   : > { %1723 = vmatprep.mubr.msk.f32.mxu1 %vm2374_vm2, %v2375_v18  ;;  %1803 = vmatprep.subr.bf16.mxu0 %v2373_v16  ;;  %v691_v26 = vld [vmem:[#allocation13 + $0x8] sm:$0xff]  ;;  %v817_v31 = vld [vmem:[#allocation14] sm:$0xff]  ;;  %v818_v32 = vld [vmem:[#allocation14 + $0x8] sm:$0xff]  ;;  %s2980_s22 = sld [smem:[#allocation31_spill]]  ;;  %v808_v58 = vshrl.u32 %v807_v55, 7  ;;  %s2376_s30 = smov 112  }
 0x12e   : > { %1741 = vmatprep.mubr.msk.f32.mxu0 %vm2374_vm2, %v2375_v18  ;;  %1799 = vmatpush3.bf16.msra.mxu1 %v1798_v17  ;;  %v596_v27 = vld [vmem:[#allocation10] sm:$0x1]  ;;  %v1801_v29 = vpack.c.bf16 %v691_v26, %v690_v25  ;;  %v1804_v33 = vpack.c.bf16 %v818_v32, %v817_v31  ;;  %v819_v37 = vld [vmem:[#allocation14 + $0x10] sm:$0xff]  ;;  %v1668_v60 = vld [vmem:[#allocation5] ss:$0 sm:$0xff]  ;;  %vm1118_vm4 = vcmask 64512  }
 0x12f   : > { %1800 = vmatprep.subr.bf16.mxu1 %v2373_v16  ;;  %v820_v38 = vld [vmem:[#allocation14 + $0x18] sm:$0xff]  ;;  %v809_v61 = vsub.s32 0, %v808_v58  ;;  %s2981_s24 = sld [smem:[#allocation32_spill]]  ;;  %s1682_s15 = sshll.u32 %s2470_s14, 7 }
 0x130   : > { %s592_s29 = scalar_lea.vmem %s2979_s19, %s591_s17  ;;  %1805 = vmatpush3.bf16.msra.mxu0 %v1804_v33  ;;  %v1807_v39 = vpack.c.bf16 %v820_v38, %v819_v37  ;;  %v971_v14 = vld [vmem:[#allocation16 + $0x18] sm:$0xff]  ;;  %s2377_s19 = smov 16  }
 0x131   : > { %v594_v0 = vld [vmem:[%s592_s29] sm:$0x1]  ;;  %1806 = vmatprep.subr.bf16.mxu0 %v2373_v16  ;;  %s589_s20 = scalar_lea.vmem [#allocation19], %s1653_s1  ;;  %s2982_s18 = sld [smem:[#allocation33_spill]] }
 0x132   : > { %v598_v2 = vsel %vm597_vm0, %v594_v0, 0.0  ;;  %s1473_s13 = sshll.u32 %s589_s20, 4  ;;  %p2983_p2 = scmp.ne.s32.totalorder %s2964_s9, 0  ;;  %s2887_s13 = int_to_ptr.vmem [resolvable:$true] %s1473_s13 }
 0x133   : > { %599 = vadd.xlane.f32.xlu0 %v598_v2  ;;  %v894_v34 = vld [vmem:[%s2980_s22] sm:$0xff]  ;;  %v895_v35 = vld [vmem:[%s2980_s22 + $0x8] sm:$0xff]  ;;  %v896_v40 = vld [vmem:[%s2980_s22 + $0x10] sm:$0xff]  ;;  %s2273_s14 = scalar_lea.vmem %s2887_s13, 128  ;;  %s2378_s1 = smov [#allocation19]  }
 0x134   : > { %v1810_v36 = vpack.c.bf16 %v895_v35, %v894_v34  ;;  %v897_v41 = vld [vmem:[%s2980_s22 + $0x18] sm:$0xff]  ;;  %1808 = vmatpush3.bf16.msra.mxu0 %v1807_v39  ;;  %p2274_p0 = scmp.ne.s32.totalorder %s2887_s13, %s2273_s14  ;;  %s2277_s29 = sshll.u32 %s2378_s1, 4  ;;  %s2278_s29 = int_to_ptr.vmem [resolvable:$false] %s2277_s29 }
 0x135   : > { %v1813_v42 = vpack.c.bf16 %v897_v41, %v896_v40  ;;  %1815 = vmatprep.subr.bf16.mxu0 %v2373_v16  ;;  %s2279_s12 = scalar_lea.vmem %s2278_s29, 256  ;;  %p2280_p11 = scmp.lt.s32.totalorder %s2887_s13, %s2278_s29 }
 0x136   : > { %p2275_p3 = pnand %p2274_p0, %p2983_p2  ;;  %p2281_p12 = scmp.lt.s32.totalorder %s2279_s12, %s2273_s14 }
 0x138   : > { %p2276_p6 = pneg %p2275_p3  ;;  %p2282_p8 = por %p2281_p12, %p2280_p11 }
 0x13a   : > { %p2283_p5 = pnand %p2282_p8, %p2276_p6 }
 0x1b9   : > { %v781_v5 = vpop.xlane.xlu1 %780 }
 0x1ba   : > { %v783_v7 = vmul.f32 0.03125, %v781_v5 }
 0x1bc   : > { %v2803_v9 = vsub.f32 %v593_v1, %v783_v7  ;;  %v1669_v1 = vld [vmem:[#allocation7] ss:$0 sm:$0xff]  ;;  %v969_v7 = vld [vmem:[#allocation16 + $0x8] sm:$0xff] }
 0x1be   : > { %v785_v11 = vmul.f32 %v2803_v9, %v2803_v9 }
 0x1c0   : > { %v600_v4 = vpop.xlane.xlu0 %599  ;;  %v786_v13 = vsel %vm778_vm1, %v785_v11, 0.0 }
 0x1c1   : > { %v602_v6 = vmul.f32 0.0625, %v600_v4  ;;  %787 = vadd.xlane.f32.xlu1 %v786_v13  ;;  %v970_v13 = vld [vmem:[#allocation16 + $0x10] sm:$0xff] }
 0x1c3   : > { %v603_v8 = vsub.f32 %v594_v0, %v602_v6  ;;  %v968_v6 = vld [vmem:[#allocation16] sm:$0xff] }
 0x1c4   : > { %v1816_v11 = vpack.c.bf16 %v969_v7, %v968_v6 }
 0x1c5   : > { %v604_v10 = vmul.f32 %v603_v8, %v603_v8 }
 0x1c7   : > { %v605_v12 = vsel %vm597_vm0, %v604_v10, 0.0 }
 0x1c8   : > { %606 = vadd.xlane.f32.xlu0 %v605_v12 }
 0x24e   : > { %v788_v43 = vpop.xlane.xlu1 %787 }
 0x24f   : > { %v789_v47 = vmul.f32 0.03125, %v788_v43 }
 0x251   : > { %v790_v51 = vadd.f32 1e-05, %v789_v47 }
 0x255   : > { %v607_v19 = vpop.xlane.xlu0 %606 }
 0x256   : > { %v608_v20 = vmul.f32 0.0625, %v607_v19 }
 0x258   : > { %v609_v21 = vadd.f32 1e-05, %v608_v20 }
 0x25a   : > { %1971 = vrsqrt.f32 %v609_v21 }
 0x264   : > { %v1972_v22 = vpop.eup %1971 }
 0x265   : > { %v611_v24 = vmul.f32 %v1972_v22, %v603_v8 }
 0x267   : > { %v612_v28 = vmul.f32 %v611_v24, %v595_v23 }
 0x269   : > { %v613_v30 = vadd.f32 %v612_v28, %v596_v27 }
 0x26b   : > { %1724 = vmatmul.mubr.msk.f32.vlgmr.msra.gmra.mrb[0].mxu1 %vm616_vm3, %v613_v30 }
 0x26c   : > { %1802 = vmatpush3.bf16.msra.mxu1 %v1801_v29  ;;  %1730 = vmatprep.mubr.msk.f32.mxu1 %vm2374_vm2, %v2375_v18 }
 0x26d   : > { %1809 = vmatprep.subr.bf16.mxu1 %v2373_v16 }
 0x26f   : > { %1731 = vmatmul.mubr.msk.f32.vlgmr.msra.gmra.mrb[2].mxu1 %vm616_vm3, %v613_v30 }
 0x270   : > { %1752 = vmatprep.mubr.msk.f32.mxu1 %vm2374_vm2, %v2375_v18  ;;  %1811 = vmatpush3.bf16.msra.mxu1 %v1810_v36 }
 0x271   : > { %1812 = vmatprep.subr.bf16.mxu1 %v2373_v16 }
 0x274   : > { %1814 = vmatpush3.bf16.msra.mxu1 %v1813_v42 }
 0x275   : > { %1766 = vmatprep.subr.mxu1 %v2375_v18 }
 0x33e   : > { %v686_v44 = vpop.f32.mrb[0].mxu1 }
 0x33f   : > { %v1666_v45 = vmul.f32 -1.442695, %v686_v44  ;;  %v1725_v46 = vpop.f32.mrb[1].mxu1 }
 0x341   : > { %1973 = vpow2.f32 %v1666_v45 }
 0x342   : > { %v758_v48 = vpop.f32.mrb[2].mxu1 }
 0x343   : > { %v1667_v49 = vmul.f32 -1.442695, %v758_v48  ;;  %v1732_v50 = vpop.f32.mrb[3].mxu1 }
 0x344   : > { %v1376_v50 = vld [vmem:[#allocation17 + $0x10] sm:$0xff] }
 0x345   : > { %1975 = vpow2.f32 %v1667_v49  ;;  %v1375_v49 = vld [vmem:[#allocation17 + $0x8] sm:$0xff] }
 0x346   : > { %1977 = vrsqrt.f32 %v790_v51 }
 0x34b   : > { %v1974_v52 = vpop.eup %1973 }
 0x34c   : > { %v765_v53 = vadd.f32 1.0, %v1974_v52  ;;  %v1377_v52 = vld [vmem:[#allocation17 + $0x18] sm:$0xff] }
 0x34e   : > { %1979 = vrcp.f32 %v765_v53  ;;  %v1825_v53 = vpack.c.bf16 %v1377_v52, %v1376_v50 }
 0x34f   : > { %v1976_v54 = vpop.eup %1975 }
 0x350   : > { %v772_v56 = vadd.f32 1.0, %v1976_v54  ;;  %v1978_v57 = vpop.eup %1977 }
 0x351   : > { %v792_v59 = vmul.f32 %v1978_v57, %v2803_v9  ;;  %v1819_v9 = vpack.c.bf16 %v971_v14, %v970_v13 }
 0x352   : > { %1981 = vrcp.f32 %v772_v56 }
 0x353   : > { %v799_v0 = vmul.f32 %v1668_v60, %v792_v59  ;;  %v1679_v59 = vld [vmem:[%s2981_s24] ss:$0 sm:$0xff] }
 0x355   : > { %v806_v4 = vadd.f32 %v1669_v1, %v799_v0 }
 0x358   : > { %v1980_v62 = vpop.eup %1979 }
 0x359   : > { %v768_v63 = vmul.f32 %v1980_v62, %v686_v44 }
 0x35b   : > { %v810_v2 = vrot.slane %v768_v63, %v809_v61 }
 0x35c   : > { %v1982_v3 = vpop.eup %1981 }
 0x35d   : > { %v775_v5 = vmul.f32 %v1982_v3, %v758_v48  ;;  %v811_v8 = vmul.f32 %v810_v2, %v806_v4  ;;  %v1374_v48 = vld [vmem:[#allocation17] sm:$0xff] }
 0x35e   : > { %v1822_v51 = vpack.c.bf16 %v1375_v49, %v1374_v48 }
 0x35f   : > { %v815_v10 = vrot.slane %v775_v5, %v809_v61 }
 0x361   : > { %v816_v12 = vadd.f32 %v815_v10, %v811_v8 }
 0x363   : > { %1742 = vmatmul.mubr.msk.f32.vlgmr.msra.gmra.mrb[0].mxu0 %vm778_vm1, %v816_v12  ;;  %1753 = vmatmul.mubr.msk.f32.vlgmr.msra.gmra.mrb[4].mxu1 %vm778_vm1, %v816_v12 }
 0x364   : > { %1817 = vmatpush3.bf16.msra.mxu0 %v1816_v11  ;;  %1763 = vmatprep.mubr.msk.f32.mxu0 %vm2374_vm2, %v2375_v18 }
 0x365   : > { %1818 = vmatprep.subr.bf16.mxu0 %v2373_v16  ;;  %1768 = vmatprep.mubr.msk.f32.mxu1 %vm2374_vm2, %v2375_v18 }
 0x368   : > { %1820 = vmatpush3.bf16.msra.mxu0 %v1819_v9 }
 0x369   : > { %1776 = vmatprep.subr.mxu0 %v2375_v18 }
 0x36b   : > { %1764 = vmatmul.mubr.msk.f32.vlgmr.msra.gmra.mrb[2].mxu0 %vm778_vm1, %v816_v12 }
 0x36c   : > { %1778 = vmatprep.mubr.msk.f32.mxu0 %vm2374_vm2, %v2375_v18 }
 0x436   : > { %v890_v15 = vpop.f32.mrb[0].mxu0  ;;  %v964_v17 = vpop.f32.mrb[4].mxu1 }
 0x437   : > { %1205 = vrot.lane.b32.xlu0 %v964_v17, %s2376_s30  ;;  %v1754_v19 = vpop.f32.mrb[5].mxu1  ;;  %1767 = vmatpush3.xpose.msk.msra.mxu1 %vm616_vm3, %v964_v17  ;;  %v1743_v20 = vpop.f32.mrb[1].mxu0 }
 0x438   : > { %1203 = vrot.lane.b32.xlu1 %v890_v15, %s2376_s30  ;;  %1771 = vmatprep.subr.mxu1 %v2375_v18 }
 0x43a   : > { %1769 = vmatmul.mubr.msk.f32.vlgmr.msra.gmra.mrb[6].mxu1 %vm616_vm3, %v890_v15 }
 0x43b   : > { %1773 = vmatprep.mubr.msk.f32.mxu1 %vm2374_vm2, %v2375_v18 }
 0x43e   : > { %v1038_v21 = vpop.f32.mrb[2].mxu0 }
 0x43f   : > { %v1765_v22 = vpop.f32.mrb[3].mxu0  ;;  %1772 = vmatpush3.msra.mxu1 %v1038_v21 }
 0x440   : > { %1781 = vmatprep.subr.mxu1 %v2375_v18 }
 0x4a9   : > { %v1206_v23 = vpop.permute.xlu0 %1205 }
 0x4aa   : > { %1777 = vmatpush3.xpose.msk.msra.mxu0 %vm616_vm3, %v1206_v23  ;;  %v1204_v24 = vpop.permute.xlu1 %1203 }
 0x4ab   : > { %1821 = vmatprep.subr.bf16.mxu0 %v2373_v16 }
 0x4ad   : > { %1779 = vmatmul.mubr.msk.f32.vlgmr.msra.gmra.mrb[4].mxu0 %vm616_vm3, %v1204_v24 }
 0x4ae   : > { %1794 = vmatprep.mubr.msk.f32.mxu0 %vm2374_vm2, %v2375_v18  ;;  %1823 = vmatpush3.bf16.msra.mxu0 %v1822_v51 }
 0x4af   : > { %1824 = vmatprep.subr.bf16.mxu0 %v2373_v16 }
 0x4b2   : > { %1826 = vmatpush3.bf16.msra.mxu0 %v1825_v53 }
 0x50d   : > { %v1114_v25 = vpop.f32.mrb[6].mxu1 }
 0x50e   : > { %v1770_v26 = vpop.f32.mrb[7].mxu1  ;;  %v1119_v27 = vsel %vm1118_vm4, %v1114_v25, -inf }
 0x50f   : > { %1120 = vmax.xlane.f32.xlu1 %v1119_v27 }
 0x580   : > { %v1277_v28 = vpop.f32.mrb[4].mxu0 }
 0x581   : > { %v1780_v29 = vpop.f32.mrb[5].mxu0  ;;  %v1281_v30 = vsel %vm1118_vm4, %v1277_v28, -inf }
 0x582   : > { %1282 = vmax.xlane.f32.xlu0 %v1281_v30 }
 0x59c   : > { %v1121_v31 = vpop.xlane.xlu1 %1120 }
 0x59d   : > { %v1122_v32 = vsub.f32 %v1114_v25, %v1121_v31 }
 0x59f   : > { %v1123_v33 = vmul.f32 1.442695, %v1122_v32 }
 0x5a1   : > { %1983 = vpow2.f32 %v1123_v33 }
 0x5ab   : > { %v1984_v34 = vpop.eup %1983 }
 0x5ac   : > { %v1125_v35 = vsel %vm1118_vm4, %v1984_v34, 0.0 }
 0x5ad   : > { %1126 = vadd.xlane.f32.xlu0 %v1125_v35 }
 0x5c3   : > { %1293 = vrot.lane.b32.xlu0 %v1038_v21, %s2376_s30  ;;  %s2885_s30 = scalar_lea.hbm %s2982_s18, %s1682_s15 }
 0x60f   : > { %v1283_v36 = vpop.xlane.xlu0 %1282 }
 0x610   : > { %v1284_v37 = vsub.f32 %v1277_v28, %v1283_v36 }
 0x612   : > { %v1285_v38 = vmul.f32 1.442695, %v1284_v37 }
 0x614   : > { %1985 = vpow2.f32 %v1285_v38 }
 0x61e   : > { %v1986_v39 = vpop.eup %1985 }
 0x61f   : > { %v1287_v40 = vsel %vm1118_vm4, %v1986_v39, 0.0 }
 0x620   : > { %1288 = vadd.xlane.f32.xlu1 %v1287_v40 }
 0x63a   : > { %v1127_v41 = vpop.xlane.xlu0 %1126 }
 0x63b   : > { %1987 = vrcp.f32 %v1127_v41 }
 0x63e   : > { %v1294_v44 = vpop.permute.xlu0 %1293 }
 0x645   : > { %v1988_v42 = vpop.eup %1987 }
 0x646   : > { %v1129_v43 = vmul.f32 %v1988_v42, %v1984_v34 }
 0x648   : > { %1774 = vmatmul.mubr.msk.f32.vlgmr.msra.gmra.mrb[8].mxu1 %vm1118_vm4, %v1129_v43 }
 0x649   : > { %1782 = vmatpush3.msra.mxu1 %v1294_v44  ;;  %1783 = vmatprep.mubr.msk.f32.mxu1 %vm2374_vm2, %v2375_v18 }
 0x6ad   : > { %v1289_v45 = vpop.xlane.xlu1 %1288 }
 0x6ae   : > { %1989 = vrcp.f32 %v1289_v45 }
 0x6b8   : > { %v1990_v46 = vpop.eup %1989 }
 0x6b9   : > { %v1291_v47 = vmul.f32 %v1990_v46, %v1986_v39 }
 0x6bb   : > { %1784 = vmatmul.mubr.msk.f32.vlgmr.msra.gmra.mrb[10].mxu1 %vm1118_vm4, %v1291_v47 }
 0x71b   : > { %v1199_v54 = vpop.f32.mrb[8].mxu1 }
 0x71c   : > { %v1775_v18 = vpop.f32.mrb[9].mxu1 }
 0x78e   : > { %v1365_v55 = vpop.f32.mrb[10].mxu1 }
 0x78f   : > { %1370 = vrot.lane.b32.xlu1 %v1365_v55, %s2377_s19  ;;  %v1785_v56 = vpop.f32.mrb[11].mxu1  ;;  %s1460_s19 = scalar_lea.sflag [#allocation4], %s2766_s2 }
 0x801   : > { %v1371_v57 = vpop.permute.xlu1 %1370 }
 0x802   : > { %v1373_v58 = vsel %vm616_vm3, %v1199_v54, %v1371_v57 }
 0x803   : > { %1795 = vmatmul.mubr.msk.f32.vlgmr.msra.gmra.mrb[6].mxu0 %vm778_vm1, %v1373_v58 }
 0x8d6   : > { %v1454_v16 = vpop.f32.mrb[6].mxu0 }
 0x8d7   : > { %v1455_v60 = vadd.f32 %v1679_v59, %v1454_v16  ;;  %v1796_v61 = vpop.f32.mrb[7].mxu0 }
 0x8d9   : > { %1458 = vst.msk [vmem:[%s589_s20] sm:$0xff] %vm778_vm1, %v1455_v60 }
 0x8da   : > { %2286 = shalt.err (!%p2283_p5)
}
 0x8db   : > { %s2287_s2 = scalar_lea.hbm %s2885_s30, 128  ;;  %s2291_s20 = scalar_lea.hbm %s2982_s18, 256 }
 0x8dc   : > { %p2288_p9 = scmp.ne.s32.totalorder %s2885_s30, %s2287_s2  ;;  %p2292_p4 = scmp.lt.u32.totalorder %s2885_s30, %s2982_s18 }
 0x8dd   : > { %p2293_p1 = scmp.lt.u32.totalorder %s2291_s20, %s2287_s2  ;;  %p2295_p0 = scmp.lt.u32.totalorder %s2287_s2, %s2885_s30 }
 0x8de   : > { %p2289_p7 = pnand %p2288_p9, %p2983_p2 }
 0x8df   : > { %p2294_p13 = por %p2293_p1, %p2292_p4 }
 0x8e0   : > { %p2290_p10 = pneg %p2289_p7 }
 0x8e1   : > { %p2296_p3 = por %p2295_p0, %p2294_p13 }
 0x8e3   : > { %p2297_p6 = pnand %p2296_p3, %p2290_p10 }
 0x8e5   : > { %2300 = shalt.err (!%p2297_p6)
}
 0x8e6   : > { %1865 = dma.vmem_to_hbm [thread:$0]  (%p2983_p2), %s2887_s13, 128, %s2885_s30, %s1460_s19  }
 0x8e7 PF: > { %s1485_s14 = sand.u32 1, %s2347_s25   ;;  %p2984_p11 = scmp.ne.s32.totalorder %s2965_s4, 0 }
 0x8e8   : > { %p2985_p12 = scmp.ge.s32.totalorder %s2359_s28, 2  ;;  %s1486_s1 = scalar_lea.sflag [#allocation4], %s1485_s14 }
 0x8ea   : > { %p1900_p8 = pnand %p2985_p12, %p2984_p11 }
 0x8ec   : > { %2342 = dma.done.wait (!%p1900_p8), %s1486_s1, 128  }
 0x8ed   : > { %2344 = vsyncadd (!%p1900_p8), %s1486_s1, 4294967168  ;;  %p31_p5 = scmp.ge.s32.totalorder %s2696_s16, 4   ;;  %s2986_s25 = smov %s2351_s26 }
 0x8ee   : > { %s2987_s26 = smov %s2355_s27  ;;  %s2988_s27 = smov %s2708_s21 }
 0x8ef   : > { %s2989_s28 = smov %s2696_s16  ;;  %33 = sbr.rel (!%p31_p5) target bundleno = 17 (0x11), region = 156 }
 0x8f6   :  { %1491 = vsyncpa [#allocation3], 1 }
 0x8f7   :  { %1493 = vsyncpa [#allocation3 + $0x1], 1 }
 0x8f8   :  { %1494 = vsyncpa [#allocation6], 1 }
 0x8f9   :  { %1495 = vsyncpa [#allocation9], 1 }
 0x8fa   :  { %1496 = vsyncpa [#allocation12], 1 }
 0x8fb   :  { %1497 = vsyncpa [#allocation15], 1 }
 0x8fc   :  { %1498 = vsyncpa [#allocation18], 1 }
 0x8fd   :  { %1499 = vsyncpa [#allocation4], 1 }
 0x8fe   :  { %1501 = vsyncpa [#allocation4 + $0x1], 1 }

</bundles_post_ra>
